<compile_context>
chip_gen: v6e
topology: v6e:2x2x1
jax: 0.10.0
libtpu: 0.0.40
codegen_flags: <defaults>
</compile_context>

<pallas_src>
import numpy as np

import jax
import jax.numpy as jnp
from jax import lax
from jax.experimental import pallas as pl
from jax.experimental.pallas import tpu as pltpu


# ---------------------------------------------------------------------------
# The fused kernel (one image per grid step)
# ---------------------------------------------------------------------------
def _lenet_kernel(x_ref, k1_ref, b1_ref, sr_ref, k2_ref, b2_ref,
                  g1_ref, fb1_ref, w2_ref, fb2_ref, w3_ref, fb3_ref, o_ref):
    xp = x_ref[0]                                   # (32, 32) padded image

    # --- conv1 + bias + ReLU :  out1[y, x*6 + co] -------------------------
    acc1 = jnp.dot(xp[0:28, :], k1_ref[0], preferred_element_type=jnp.float32)
    for ki in range(1, 5):
        acc1 = acc1 + jnp.dot(xp[ki:ki + 28, :], k1_ref[ki],
                              preferred_element_type=jnp.float32)
    out1 = jnp.maximum(acc1 + b1_ref[...], 0.0)     # (28, 168)

    # --- max-pool 2x2/2 : pairwise max, then even-row compaction ----------
    n1 = jnp.maximum(out1[:, :162], out1[:, 6:])    # column-pair max  (28, 162)
    p1 = jnp.maximum(n1[:27, :], n1[1:, :])         # row-pair max     (27, 162)
    p1e = jnp.dot(sr_ref[...], p1,                  # rows 0,2,...,26  (14, 162)
                  preferred_element_type=jnp.float32)

    # --- conv2 + bias + ReLU :  out2[y, x*16 + co] -------------------------
    # (even-column selection of pool1 is folded into k2's zero pattern)
    acc2 = jnp.dot(p1e[0:10, :], k2_ref[0], preferred_element_type=jnp.float32)
    for ki in range(1, 5):
        acc2 = acc2 + jnp.dot(p1e[ki:ki + 10, :], k2_ref[ki],
                              preferred_element_type=jnp.float32)
    out2 = jnp.maximum(acc2 + b2_ref[...], 0.0)     # (10, 160)

    # --- max-pool 2x2/2 (even-row/col selection folded into g1) -----------
    n2 = jnp.maximum(out2[:, :144], out2[:, 16:])   # (10, 144)
    p2 = jnp.maximum(n2[:9, :], n2[1:, :])          # (9, 144)
    feats = jnp.concatenate(
        [p2[0:1, :], p2[2:3, :], p2[4:5, :], p2[6:7, :], p2[8:9, :]],
        axis=1)                                     # (1, 720)

    # --- fc1 / fc2 / fc3 ----------------------------------------------------
    h = jnp.dot(feats, g1_ref[...], preferred_element_type=jnp.float32) + fb1_ref[...]
    h = jnp.maximum(h, 0.0)                         # (1, 120)
    h = jnp.dot(h, w2_ref[...], preferred_element_type=jnp.float32) + fb2_ref[...]
    h = jnp.maximum(h, 0.0)                         # (1, 84)
    o_ref[0] = jnp.dot(h, w3_ref[...], preferred_element_type=jnp.float32) + fb3_ref[...]


# ---------------------------------------------------------------------------
# One-time host-side weight packing (banded conv matrices, folded selections)
# ---------------------------------------------------------------------------
def pack_params(params):
    w1 = np.asarray(params["conv1_w"], np.float32)   # (6, 1, 5, 5)
    b1 = np.asarray(params["conv1_b"], np.float32)   # (6,)
    w2 = np.asarray(params["conv2_w"], np.float32)   # (16, 6, 5, 5)
    b2 = np.asarray(params["conv2_b"], np.float32)   # (16,)
    fw1 = np.asarray(params["fc1_w"], np.float32)    # (120, 400)
    fb1 = np.asarray(params["fc1_b"], np.float32)    # (120,)
    fw2 = np.asarray(params["fc2_w"], np.float32)    # (84, 120)
    fb2 = np.asarray(params["fc2_b"], np.float32)    # (84,)
    fw3 = np.asarray(params["fc3_w"], np.float32)    # (10, 84)
    fb3 = np.asarray(params["fc3_b"], np.float32)    # (10,)

    # conv1 banded weights: K1[ki, x+kj, x*6+co] = w1[co, 0, ki, kj]
    K1 = np.zeros((5, 32, 168), np.float32)
    ki, x, kj, co = np.meshgrid(np.arange(5), np.arange(28), np.arange(5),
                                np.arange(6), indexing="ij")
    K1[ki, x + kj, x * 6 + co] = w1[co, 0, ki, kj]

    # pool1 even-row selector (picks rows 0,2,...,26 of the pair-max array)
    Sr = (np.arange(27)[None, :] == 2 * np.arange(14)[:, None]).astype(np.float32)

    # conv2 banded weights operating directly on the pooled (even-column) layout:
    # K2[ki, 2*(px+kj)*6 + c, px*16 + co] = w2[co, c, ki, kj]
    K2 = np.zeros((5, 162, 160), np.float32)
    ki, c, kj, px, co = np.meshgrid(np.arange(5), np.arange(6), np.arange(5),
                                    np.arange(10), np.arange(16), indexing="ij")
    K2[ki, 2 * (px + kj) * 6 + c, px * 16 + co] = w2[co, c, ki, kj]

    # fc1 weights with pool2 even-column selection + PyTorch NCHW flatten folded in:
    # G1[r*144 + 2*qx*16 + co, j] = fc1_w[j, co*25 + r*5 + qx]
    G1 = np.zeros((720, 120), np.float32)
    r, qx, co, j = np.meshgrid(np.arange(5), np.arange(5), np.arange(16),
                               np.arange(120), indexing="ij")
    G1[r * 144 + 2 * qx * 16 + co, j] = fw1[j, co * 25 + r * 5 + qx]

    return (
        jnp.asarray(K1),                                     # (5, 32, 168)
        jnp.asarray(np.tile(b1, 28).reshape(1, 168)),        # conv1 bias tiled
        jnp.asarray(Sr),                                     # (14, 27)
        jnp.asarray(K2),                                     # (5, 162, 160)
        jnp.asarray(np.tile(b2, 10).reshape(1, 160)),        # conv2 bias tiled
        jnp.asarray(G1),                                     # (720, 120)
        jnp.asarray(fb1.reshape(1, 120)),
        jnp.asarray(np.ascontiguousarray(fw2.T)),            # (120, 84)
        jnp.asarray(fb2.reshape(1, 84)),
        jnp.asarray(np.ascontiguousarray(fw3.T)),            # (84, 10)
        jnp.asarray(fb3.reshape(1, 10)),
    )


# ---------------------------------------------------------------------------
# Forward pass: a single pallas_call over the batch
# ---------------------------------------------------------------------------
def lenet_forward(packed, x):
    weights = tuple(packed)
    B = x.shape[0]
    # conv1 has padding=2 -> pad once in the wrapper (cheap glue).
    xp = jnp.pad(x[:, 0].astype(jnp.float32), ((0, 0), (2, 2), (2, 2)))  # (B, 32, 32)

    def _const_spec(a):
        nd = a.ndim
        return pl.BlockSpec(a.shape, lambda b, _n=nd: (0,) * _n)

    flops_per_img = 2 * (5 * 28 * 32 * 168 + 14 * 27 * 162 + 5 * 10 * 168 * 160
                         + 720 * 120 + 120 * 84 + 84 * 10)
    w_bytes = sum(int(np.prod(w.shape)) for w in weights) * 4
    cost = pl.CostEstimate(
        flops=B * flops_per_img,
        transcendentals=0,
        bytes_accessed=w_bytes + B * (32 * 32 + 10) * 4,
    )

    out = pl.pallas_call(
        _lenet_kernel,
        out_shape=jax.ShapeDtypeStruct((B, 1, 10), jnp.float32),
        grid=(B,),
        in_specs=[pl.BlockSpec((1, 32, 32), lambda b: (b, 0, 0))]
                 + [_const_spec(w) for w in weights],
        out_specs=pl.BlockSpec((1, 1, 10), lambda b: (b, 0, 0)),
        compiler_params=pltpu.CompilerParams(
            dimension_semantics=("parallel",),
            vmem_limit_bytes=32 * 1024 * 1024,
        ),
        cost_estimate=cost,
    )(xp, *weights)
    return out[:, 0, :]


# ---------------------------------------------------------------------------
# LeNet parameters (deterministic, PyTorch-style uniform(-1/sqrt(fan_in), ..))
# ---------------------------------------------------------------------------
def init_lenet_params(key):
    def uni(k, shape, fan_in):
        bound = 1.0 / float(fan_in) ** 0.5
        return jax.random.uniform(k, shape, jnp.float32, -bound, bound)

    ks = jax.random.split(key, 10)
    return {
        "conv1_w": uni(ks[0], (6, 1, 5, 5), 1 * 5 * 5),
        "conv1_b": uni(ks[1], (6,), 1 * 5 * 5),
        "conv2_w": uni(ks[2], (16, 6, 5, 5), 6 * 5 * 5),
        "conv2_b": uni(ks[3], (16,), 6 * 5 * 5),
        "fc1_w": uni(ks[4], (120, 400), 400),
        "fc1_b": uni(ks[5], (120,), 400),
        "fc2_w": uni(ks[6], (84, 120), 120),
        "fc2_b": uni(ks[7], (84,), 120),
        "fc3_w": uni(ks[8], (10, 84), 84),
        "fc3_b": uni(ks[9], (10,), 84),
    }


# ---------------------------------------------------------------------------
# Plain-JAX reference (for correctness check)
# ---------------------------------------------------------------------------
def lenet_reference(params, x):
    def conv(x, w, b, pad):
        out = lax.conv_general_dilated(
            x, w, (1, 1), ((pad, pad), (pad, pad)),
            dimension_numbers=("NCHW", "OIHW", "NCHW"))
        return out + b.reshape(1, -1, 1, 1)

    def pool(x):
        return lax.reduce_window(x, -jnp.inf, lax.max, (1, 1, 2, 2), (1, 1, 2, 2), "VALID")

    out = jax.nn.relu(conv(x, params["conv1_w"], params["conv1_b"], 2))
    out = pool(out)
    out = jax.nn.relu(conv(out, params["conv2_w"], params["conv2_b"], 0))
    out = pool(out)
    out = out.reshape(out.shape[0], -1)
    out = jax.nn.relu(out @ params["fc1_w"].T + params["fc1_b"])
    feats = jax.nn.relu(out @ params["fc2_w"].T + params["fc2_b"])
    return feats @ params["fc3_w"].T + params["fc3_b"]


if __name__ == "__main__":
    key = jax.random.PRNGKey(0)
    pkey, xkey = jax.random.split(key)
    params = init_lenet_params(pkey)
    x = jax.random.normal(xkey, (2, 1, 28, 28), jnp.float32)

    packed = pack_params(params)          # one-time host-side weight packing
    fwd = jax.jit(lenet_forward)

    out = jax.block_until_ready(fwd(packed, x))
    assert out.shape == (2, 10)

    ref = lenet_reference(params, x)
    err = float(jnp.max(jnp.abs(out - ref)))
    assert jnp.allclose(out, ref, atol=1e-3, rtol=1e-3), f"max abs err {err}"

    print("KERNEL_OK")
</pallas_src>

<mosaic_0001>
module attributes {stable_mosaic.version = 11 : i64} {
  func.func @_lenet_kernel(%arg0: i32, %arg1: memref<1x32x32xf32, #tpu.memory_space<vmem>>, %arg2: memref<5x32x168xf32, #tpu.memory_space<vmem>>, %arg3: memref<1x168xf32, #tpu.memory_space<vmem>>, %arg4: memref<14x27xf32, #tpu.memory_space<vmem>>, %arg5: memref<5x162x160xf32, #tpu.memory_space<vmem>>, %arg6: memref<1x160xf32, #tpu.memory_space<vmem>>, %arg7: memref<720x120xf32, #tpu.memory_space<vmem>>, %arg8: memref<1x120xf32, #tpu.memory_space<vmem>>, %arg9: memref<120x84xf32, #tpu.memory_space<vmem>>, %arg10: memref<1x84xf32, #tpu.memory_space<vmem>>, %arg11: memref<84x10xf32, #tpu.memory_space<vmem>>, %arg12: memref<1x10xf32, #tpu.memory_space<vmem>>, %arg13: memref<1x1x10xf32, #tpu.memory_space<vmem>>) attributes {dimension_semantics = [#tpu.dimension_semantics<parallel>], iteration_bounds = array<i64: 2>, scalar_prefetch = 0 : i64, scratch_operands = 0 : i64, tpu.core_type = #tpu.core_type<tc>, window_params = [{transform_indices = @transform_0, window_bounds = array<i64: 1, 32, 32>}, {pipeline_mode = #tpu.pipeline_mode<synchronous>, transform_indices = @transform_1, window_bounds = array<i64: 5, 32, 168>}, {pipeline_mode = #tpu.pipeline_mode<synchronous>, transform_indices = @transform_2, window_bounds = array<i64: 1, 168>}, {pipeline_mode = #tpu.pipeline_mode<synchronous>, transform_indices = @transform_3, window_bounds = array<i64: 14, 27>}, {pipeline_mode = #tpu.pipeline_mode<synchronous>, transform_indices = @transform_4, window_bounds = array<i64: 5, 162, 160>}, {pipeline_mode = #tpu.pipeline_mode<synchronous>, transform_indices = @transform_5, window_bounds = array<i64: 1, 160>}, {pipeline_mode = #tpu.pipeline_mode<synchronous>, transform_indices = @transform_6, window_bounds = array<i64: 720, 120>}, {pipeline_mode = #tpu.pipeline_mode<synchronous>, transform_indices = @transform_7, window_bounds = array<i64: 1, 120>}, {pipeline_mode = #tpu.pipeline_mode<synchronous>, transform_indices = @transform_8, window_bounds = array<i64: 120, 84>}, {pipeline_mode = #tpu.pipeline_mode<synchronous>, transform_indices = @transform_9, window_bounds = array<i64: 1, 84>}, {pipeline_mode = #tpu.pipeline_mode<synchronous>, transform_indices = @transform_10, window_bounds = array<i64: 84, 10>}, {pipeline_mode = #tpu.pipeline_mode<synchronous>, transform_indices = @transform_11, window_bounds = array<i64: 1, 10>}, {transform_indices = @transform_12, window_bounds = array<i64: 1, 1, 10>}]} {
    %c0 = arith.constant 0 : index
    %c0_0 = arith.constant 0 : index
    %c0_1 = arith.constant 0 : index
    %0 = vector.load %arg1[%c0, %c0_0, %c0_1] : memref<1x32x32xf32, #tpu.memory_space<vmem>>, vector<1x32x32xf32>
    %1 = vector.shape_cast %0 : vector<1x32x32xf32> to vector<32x32xf32>
    %2 = vector.extract_strided_slice %1 {offsets = [0, 0], sizes = [28, 32], strides = [1, 1]} : vector<32x32xf32> to vector<28x32xf32>
    %c0_2 = arith.constant 0 : index
    %c0_3 = arith.constant 0 : index
    %c0_4 = arith.constant 0 : index
    %3 = vector.load %arg2[%c0_2, %c0_3, %c0_4] : memref<5x32x168xf32, #tpu.memory_space<vmem>>, vector<1x32x168xf32>
    %4 = vector.shape_cast %3 : vector<1x32x168xf32> to vector<32x168xf32>
    %cst = arith.constant dense<0.000000e+00> : vector<28x168xf32>
    %5 = tpu.matmul %2, %4, %cst {dimension_numbers = #tpu.dot_dimension_numbers<[1], [0], [0], [1], [0, 0, 1, 1], [], []>} : vector<28x32xf32>, vector<32x168xf32>, vector<28x168xf32> -> vector<28x168xf32>
    %6 = vector.extract_strided_slice %1 {offsets = [1, 0], sizes = [28, 32], strides = [1, 1]} : vector<32x32xf32> to vector<28x32xf32>
    %c1 = arith.constant 1 : index
    %c0_5 = arith.constant 0 : index
    %c0_6 = arith.constant 0 : index
    %7 = vector.load %arg2[%c1, %c0_5, %c0_6] : memref<5x32x168xf32, #tpu.memory_space<vmem>>, vector<1x32x168xf32>
    %8 = vector.shape_cast %7 : vector<1x32x168xf32> to vector<32x168xf32>
    %cst_7 = arith.constant dense<0.000000e+00> : vector<28x168xf32>
    %9 = tpu.matmul %6, %8, %cst_7 {dimension_numbers = #tpu.dot_dimension_numbers<[1], [0], [0], [1], [0, 0, 1, 1], [], []>} : vector<28x32xf32>, vector<32x168xf32>, vector<28x168xf32> -> vector<28x168xf32>
    %10 = arith.addf %5, %9 : vector<28x168xf32>
    %11 = vector.extract_strided_slice %1 {offsets = [2, 0], sizes = [28, 32], strides = [1, 1]} : vector<32x32xf32> to vector<28x32xf32>
    %c2 = arith.constant 2 : index
    %c0_8 = arith.constant 0 : index
    %c0_9 = arith.constant 0 : index
    %12 = vector.load %arg2[%c2, %c0_8, %c0_9] : memref<5x32x168xf32, #tpu.memory_space<vmem>>, vector<1x32x168xf32>
    %13 = vector.shape_cast %12 : vector<1x32x168xf32> to vector<32x168xf32>
    %cst_10 = arith.constant dense<0.000000e+00> : vector<28x168xf32>
    %14 = tpu.matmul %11, %13, %cst_10 {dimension_numbers = #tpu.dot_dimension_numbers<[1], [0], [0], [1], [0, 0, 1, 1], [], []>} : vector<28x32xf32>, vector<32x168xf32>, vector<28x168xf32> -> vector<28x168xf32>
    %15 = arith.addf %10, %14 : vector<28x168xf32>
    %16 = vector.extract_strided_slice %1 {offsets = [3, 0], sizes = [28, 32], strides = [1, 1]} : vector<32x32xf32> to vector<28x32xf32>
    %c3 = arith.constant 3 : index
    %c0_11 = arith.constant 0 : index
    %c0_12 = arith.constant 0 : index
    %17 = vector.load %arg2[%c3, %c0_11, %c0_12] : memref<5x32x168xf32, #tpu.memory_space<vmem>>, vector<1x32x168xf32>
    %18 = vector.shape_cast %17 : vector<1x32x168xf32> to vector<32x168xf32>
    %cst_13 = arith.constant dense<0.000000e+00> : vector<28x168xf32>
    %19 = tpu.matmul %16, %18, %cst_13 {dimension_numbers = #tpu.dot_dimension_numbers<[1], [0], [0], [1], [0, 0, 1, 1], [], []>} : vector<28x32xf32>, vector<32x168xf32>, vector<28x168xf32> -> vector<28x168xf32>
    %20 = arith.addf %15, %19 : vector<28x168xf32>
    %21 = vector.extract_strided_slice %1 {offsets = [4, 0], sizes = [28, 32], strides = [1, 1]} : vector<32x32xf32> to vector<28x32xf32>
    %c4 = arith.constant 4 : index
    %c0_14 = arith.constant 0 : index
    %c0_15 = arith.constant 0 : index
    %22 = vector.load %arg2[%c4, %c0_14, %c0_15] : memref<5x32x168xf32, #tpu.memory_space<vmem>>, vector<1x32x168xf32>
    %23 = vector.shape_cast %22 : vector<1x32x168xf32> to vector<32x168xf32>
    %cst_16 = arith.constant dense<0.000000e+00> : vector<28x168xf32>
    %24 = tpu.matmul %21, %23, %cst_16 {dimension_numbers = #tpu.dot_dimension_numbers<[1], [0], [0], [1], [0, 0, 1, 1], [], []>} : vector<28x32xf32>, vector<32x168xf32>, vector<28x168xf32> -> vector<28x168xf32>
    %25 = arith.addf %20, %24 : vector<28x168xf32>
    %c0_17 = arith.constant 0 : index
    %c0_18 = arith.constant 0 : index
    %26 = vector.load %arg3[%c0_17, %c0_18] : memref<1x168xf32, #tpu.memory_space<vmem>>, vector<1x168xf32>
    %27 = vector.broadcast %26 : vector<1x168xf32> to vector<28x168xf32>
    %28 = arith.addf %25, %27 : vector<28x168xf32>
    %cst_19 = arith.constant 0.000000e+00 : f32
    %29 = vector.broadcast %cst_19 : f32 to vector<28x168xf32>
    %30 = arith.maximumf %28, %29 : vector<28x168xf32>
    %31 = vector.extract_strided_slice %30 {offsets = [0, 0], sizes = [28, 162], strides = [1, 1]} : vector<28x168xf32> to vector<28x162xf32>
    %32 = vector.extract_strided_slice %30 {offsets = [0, 6], sizes = [28, 162], strides = [1, 1]} : vector<28x168xf32> to vector<28x162xf32>
    %33 = arith.maximumf %31, %32 : vector<28x162xf32>
    %34 = vector.extract_strided_slice %33 {offsets = [0, 0], sizes = [27, 162], strides = [1, 1]} : vector<28x162xf32> to vector<27x162xf32>
    %35 = vector.extract_strided_slice %33 {offsets = [1, 0], sizes = [27, 162], strides = [1, 1]} : vector<28x162xf32> to vector<27x162xf32>
    %36 = arith.maximumf %34, %35 : vector<27x162xf32>
    %c0_20 = arith.constant 0 : index
    %c0_21 = arith.constant 0 : index
    %37 = vector.load %arg4[%c0_20, %c0_21] : memref<14x27xf32, #tpu.memory_space<vmem>>, vector<14x27xf32>
    %cst_22 = arith.constant dense<0.000000e+00> : vector<14x162xf32>
    %38 = tpu.matmul %37, %36, %cst_22 {dimension_numbers = #tpu.dot_dimension_numbers<[1], [0], [0], [1], [0, 0, 1, 1], [], []>} : vector<14x27xf32>, vector<27x162xf32>, vector<14x162xf32> -> vector<14x162xf32>
    %39 = vector.extract_strided_slice %38 {offsets = [0, 0], sizes = [10, 162], strides = [1, 1]} : vector<14x162xf32> to vector<10x162xf32>
    %c0_23 = arith.constant 0 : index
    %c0_24 = arith.constant 0 : index
    %c0_25 = arith.constant 0 : index
    %40 = vector.load %arg5[%c0_23, %c0_24, %c0_25] : memref<5x162x160xf32, #tpu.memory_space<vmem>>, vector<1x162x160xf32>
    %41 = vector.shape_cast %40 : vector<1x162x160xf32> to vector<162x160xf32>
    %cst_26 = arith.constant dense<0.000000e+00> : vector<10x160xf32>
    %42 = tpu.matmul %39, %41, %cst_26 {dimension_numbers = #tpu.dot_dimension_numbers<[1], [0], [0], [1], [0, 0, 1, 1], [], []>} : vector<10x162xf32>, vector<162x160xf32>, vector<10x160xf32> -> vector<10x160xf32>
    %43 = vector.extract_strided_slice %38 {offsets = [1, 0], sizes = [10, 162], strides = [1, 1]} : vector<14x162xf32> to vector<10x162xf32>
    %c1_27 = arith.constant 1 : index
    %c0_28 = arith.constant 0 : index
    %c0_29 = arith.constant 0 : index
    %44 = vector.load %arg5[%c1_27, %c0_28, %c0_29] : memref<5x162x160xf32, #tpu.memory_space<vmem>>, vector<1x162x160xf32>
    %45 = vector.shape_cast %44 : vector<1x162x160xf32> to vector<162x160xf32>
    %cst_30 = arith.constant dense<0.000000e+00> : vector<10x160xf32>
    %46 = tpu.matmul %43, %45, %cst_30 {dimension_numbers = #tpu.dot_dimension_numbers<[1], [0], [0], [1], [0, 0, 1, 1], [], []>} : vector<10x162xf32>, vector<162x160xf32>, vector<10x160xf32> -> vector<10x160xf32>
    %47 = arith.addf %42, %46 : vector<10x160xf32>
    %48 = vector.extract_strided_slice %38 {offsets = [2, 0], sizes = [10, 162], strides = [1, 1]} : vector<14x162xf32> to vector<10x162xf32>
    %c2_31 = arith.constant 2 : index
    %c0_32 = arith.constant 0 : index
    %c0_33 = arith.constant 0 : index
    %49 = vector.load %arg5[%c2_31, %c0_32, %c0_33] : memref<5x162x160xf32, #tpu.memory_space<vmem>>, vector<1x162x160xf32>
    %50 = vector.shape_cast %49 : vector<1x162x160xf32> to vector<162x160xf32>
    %cst_34 = arith.constant dense<0.000000e+00> : vector<10x160xf32>
    %51 = tpu.matmul %48, %50, %cst_34 {dimension_numbers = #tpu.dot_dimension_numbers<[1], [0], [0], [1], [0, 0, 1, 1], [], []>} : vector<10x162xf32>, vector<162x160xf32>, vector<10x160xf32> -> vector<10x160xf32>
    %52 = arith.addf %47, %51 : vector<10x160xf32>
    %53 = vector.extract_strided_slice %38 {offsets = [3, 0], sizes = [10, 162], strides = [1, 1]} : vector<14x162xf32> to vector<10x162xf32>
    %c3_35 = arith.constant 3 : index
    %c0_36 = arith.constant 0 : index
    %c0_37 = arith.constant 0 : index
    %54 = vector.load %arg5[%c3_35, %c0_36, %c0_37] : memref<5x162x160xf32, #tpu.memory_space<vmem>>, vector<1x162x160xf32>
    %55 = vector.shape_cast %54 : vector<1x162x160xf32> to vector<162x160xf32>
    %cst_38 = arith.constant dense<0.000000e+00> : vector<10x160xf32>
    %56 = tpu.matmul %53, %55, %cst_38 {dimension_numbers = #tpu.dot_dimension_numbers<[1], [0], [0], [1], [0, 0, 1, 1], [], []>} : vector<10x162xf32>, vector<162x160xf32>, vector<10x160xf32> -> vector<10x160xf32>
    %57 = arith.addf %52, %56 : vector<10x160xf32>
    %58 = vector.extract_strided_slice %38 {offsets = [4, 0], sizes = [10, 162], strides = [1, 1]} : vector<14x162xf32> to vector<10x162xf32>
    %c4_39 = arith.constant 4 : index
    %c0_40 = arith.constant 0 : index
    %c0_41 = arith.constant 0 : index
    %59 = vector.load %arg5[%c4_39, %c0_40, %c0_41] : memref<5x162x160xf32, #tpu.memory_space<vmem>>, vector<1x162x160xf32>
    %60 = vector.shape_cast %59 : vector<1x162x160xf32> to vector<162x160xf32>
    %cst_42 = arith.constant dense<0.000000e+00> : vector<10x160xf32>
    %61 = tpu.matmul %58, %60, %cst_42 {dimension_numbers = #tpu.dot_dimension_numbers<[1], [0], [0], [1], [0, 0, 1, 1], [], []>} : vector<10x162xf32>, vector<162x160xf32>, vector<10x160xf32> -> vector<10x160xf32>
    %62 = arith.addf %57, %61 : vector<10x160xf32>
    %c0_43 = arith.constant 0 : index
    %c0_44 = arith.constant 0 : index
    %63 = vector.load %arg6[%c0_43, %c0_44] : memref<1x160xf32, #tpu.memory_space<vmem>>, vector<1x160xf32>
    %64 = vector.broadcast %63 : vector<1x160xf32> to vector<10x160xf32>
    %65 = arith.addf %62, %64 : vector<10x160xf32>
    %cst_45 = arith.constant 0.000000e+00 : f32
    %66 = vector.broadcast %cst_45 : f32 to vector<10x160xf32>
    %67 = arith.maximumf %65, %66 : vector<10x160xf32>
    %68 = vector.extract_strided_slice %67 {offsets = [0, 0], sizes = [10, 144], strides = [1, 1]} : vector<10x160xf32> to vector<10x144xf32>
    %69 = vector.extract_strided_slice %67 {offsets = [0, 16], sizes = [10, 144], strides = [1, 1]} : vector<10x160xf32> to vector<10x144xf32>
    %70 = arith.maximumf %68, %69 : vector<10x144xf32>
    %71 = vector.extract_strided_slice %70 {offsets = [0, 0], sizes = [9, 144], strides = [1, 1]} : vector<10x144xf32> to vector<9x144xf32>
    %72 = vector.extract_strided_slice %70 {offsets = [1, 0], sizes = [9, 144], strides = [1, 1]} : vector<10x144xf32> to vector<9x144xf32>
    %73 = arith.maximumf %71, %72 : vector<9x144xf32>
    %74 = vector.extract_strided_slice %73 {offsets = [0, 0], sizes = [1, 144], strides = [1, 1]} : vector<9x144xf32> to vector<1x144xf32>
    %75 = vector.extract_strided_slice %73 {offsets = [2, 0], sizes = [1, 144], strides = [1, 1]} : vector<9x144xf32> to vector<1x144xf32>
    %76 = vector.extract_strided_slice %73 {offsets = [4, 0], sizes = [1, 144], strides = [1, 1]} : vector<9x144xf32> to vector<1x144xf32>
    %77 = vector.extract_strided_slice %73 {offsets = [6, 0], sizes = [1, 144], strides = [1, 1]} : vector<9x144xf32> to vector<1x144xf32>
    %78 = vector.extract_strided_slice %73 {offsets = [8, 0], sizes = [1, 144], strides = [1, 1]} : vector<9x144xf32> to vector<1x144xf32>
    %79 = tpu.concatenate %74, %75, %76, %77, %78 in 1 : vector<1x144xf32>, vector<1x144xf32>, vector<1x144xf32>, vector<1x144xf32>, vector<1x144xf32> -> vector<1x720xf32>
    %c0_46 = arith.constant 0 : index
    %c0_47 = arith.constant 0 : index
    %80 = vector.load %arg7[%c0_46, %c0_47] : memref<720x120xf32, #tpu.memory_space<vmem>>, vector<720x120xf32>
    %cst_48 = arith.constant dense<0.000000e+00> : vector<1x120xf32>
    %81 = tpu.matmul %79, %80, %cst_48 {dimension_numbers = #tpu.dot_dimension_numbers<[1], [0], [0], [1], [0, 0, 1, 1], [], []>} : vector<1x720xf32>, vector<720x120xf32>, vector<1x120xf32> -> vector<1x120xf32>
    %c0_49 = arith.constant 0 : index
    %c0_50 = arith.constant 0 : index
    %82 = vector.load %arg8[%c0_49, %c0_50] : memref<1x120xf32, #tpu.memory_space<vmem>>, vector<1x120xf32>
    %83 = arith.addf %81, %82 : vector<1x120xf32>
    %cst_51 = arith.constant 0.000000e+00 : f32
    %84 = vector.broadcast %cst_51 : f32 to vector<1x120xf32>
    %85 = arith.maximumf %83, %84 : vector<1x120xf32>
    %c0_52 = arith.constant 0 : index
    %c0_53 = arith.constant 0 : index
    %86 = vector.load %arg9[%c0_52, %c0_53] : memref<120x84xf32, #tpu.memory_space<vmem>>, vector<120x84xf32>
    %cst_54 = arith.constant dense<0.000000e+00> : vector<1x84xf32>
    %87 = tpu.matmul %85, %86, %cst_54 {dimension_numbers = #tpu.dot_dimension_numbers<[1], [0], [0], [1], [0, 0, 1, 1], [], []>} : vector<1x120xf32>, vector<120x84xf32>, vector<1x84xf32> -> vector<1x84xf32>
    %c0_55 = arith.constant 0 : index
    %c0_56 = arith.constant 0 : index
    %88 = vector.load %arg10[%c0_55, %c0_56] : memref<1x84xf32, #tpu.memory_space<vmem>>, vector<1x84xf32>
    %89 = arith.addf %87, %88 : vector<1x84xf32>
    %cst_57 = arith.constant 0.000000e+00 : f32
    %90 = vector.broadcast %cst_57 : f32 to vector<1x84xf32>
    %91 = arith.maximumf %89, %90 : vector<1x84xf32>
    %c0_58 = arith.constant 0 : index
    %c0_59 = arith.constant 0 : index
    %92 = vector.load %arg11[%c0_58, %c0_59] : memref<84x10xf32, #tpu.memory_space<vmem>>, vector<84x10xf32>
    %cst_60 = arith.constant dense<0.000000e+00> : vector<1x10xf32>
    %93 = tpu.matmul %91, %92, %cst_60 {dimension_numbers = #tpu.dot_dimension_numbers<[1], [0], [0], [1], [0, 0, 1, 1], [], []>} : vector<1x84xf32>, vector<84x10xf32>, vector<1x10xf32> -> vector<1x10xf32>
    %c0_61 = arith.constant 0 : index
    %c0_62 = arith.constant 0 : index
    %94 = vector.load %arg12[%c0_61, %c0_62] : memref<1x10xf32, #tpu.memory_space<vmem>>, vector<1x10xf32>
    %95 = arith.addf %93, %94 : vector<1x10xf32>
    %c0_63 = arith.constant 0 : index
    %c0_64 = arith.constant 0 : index
    %c0_65 = arith.constant 0 : index
    %96 = vector.load %arg13[%c0_63, %c0_64, %c0_65] : memref<1x1x10xf32, #tpu.memory_space<vmem>>, vector<1x1x10xf32>
    %97 = vector.shape_cast %96 : vector<1x1x10xf32> to vector<1x10xf32>
    %98 = vector.shape_cast %95 : vector<1x10xf32> to vector<1x1x10xf32>
    tpu.vector_store %arg13[%c0_63, %c0_64, %c0_65], %98 {strides = array<i32>} : memref<1x1x10xf32, #tpu.memory_space<vmem>>, vector<1x1x10xf32>,
    return
  }
  func.func @transform_0(%arg0: i32) -> (i32, i32, i32) {
    %c0_i32 = arith.constant 0 : i32
    %c0_i32_0 = arith.constant 0 : i32
    %c0_i32_1 = arith.constant 0 : i32
    return %arg0, %c0_i32, %c0_i32_0 : i32, i32, i32
  }
  func.func @transform_1(%arg0: i32) -> (i32, i32, i32) {
    %c0_i32 = arith.constant 0 : i32
    %c0_i32_0 = arith.constant 0 : i32
    %c0_i32_1 = arith.constant 0 : i32
    %c0_i32_2 = arith.constant 0 : i32
    return %c0_i32, %c0_i32_0, %c0_i32_1 : i32, i32, i32
  }
  func.func @transform_2(%arg0: i32) -> (i32, i32) {
    %c0_i32 = arith.constant 0 : i32
    %c0_i32_0 = arith.constant 0 : i32
    %c0_i32_1 = arith.constant 0 : i32
    return %c0_i32, %c0_i32_0 : i32, i32
  }
  func.func @transform_3(%arg0: i32) -> (i32, i32) {
    %c0_i32 = arith.constant 0 : i32
    %c0_i32_0 = arith.constant 0 : i32
    %c0_i32_1 = arith.constant 0 : i32
    return %c0_i32, %c0_i32_0 : i32, i32
  }
  func.func @transform_4(%arg0: i32) -> (i32, i32, i32) {
    %c0_i32 = arith.constant 0 : i32
    %c0_i32_0 = arith.constant 0 : i32
    %c0_i32_1 = arith.constant 0 : i32
    %c0_i32_2 = arith.constant 0 : i32
    return %c0_i32, %c0_i32_0, %c0_i32_1 : i32, i32, i32
  }
  func.func @transform_5(%arg0: i32) -> (i32, i32) {
    %c0_i32 = arith.constant 0 : i32
    %c0_i32_0 = arith.constant 0 : i32
    %c0_i32_1 = arith.constant 0 : i32
    return %c0_i32, %c0_i32_0 : i32, i32
  }
  func.func @transform_6(%arg0: i32) -> (i32, i32) {
    %c0_i32 = arith.constant 0 : i32
    %c0_i32_0 = arith.constant 0 : i32
    %c0_i32_1 = arith.constant 0 : i32
    return %c0_i32, %c0_i32_0 : i32, i32
  }
  func.func @transform_7(%arg0: i32) -> (i32, i32) {
    %c0_i32 = arith.constant 0 : i32
    %c0_i32_0 = arith.constant 0 : i32
    %c0_i32_1 = arith.constant 0 : i32
    return %c0_i32, %c0_i32_0 : i32, i32
  }
  func.func @transform_8(%arg0: i32) -> (i32, i32) {
    %c0_i32 = arith.constant 0 : i32
    %c0_i32_0 = arith.constant 0 : i32
    %c0_i32_1 = arith.constant 0 : i32
    return %c0_i32, %c0_i32_0 : i32, i32
  }
  func.func @transform_9(%arg0: i32) -> (i32, i32) {
    %c0_i32 = arith.constant 0 : i32
    %c0_i32_0 = arith.constant 0 : i32
    %c0_i32_1 = arith.constant 0 : i32
    return %c0_i32, %c0_i32_0 : i32, i32
  }
  func.func @transform_10(%arg0: i32) -> (i32, i32) {
    %c0_i32 = arith.constant 0 : i32
    %c0_i32_0 = arith.constant 0 : i32
    %c0_i32_1 = arith.constant 0 : i32
    return %c0_i32, %c0_i32_0 : i32, i32
  }
  func.func @transform_11(%arg0: i32) -> (i32, i32) {
    %c0_i32 = arith.constant 0 : i32
    %c0_i32_0 = arith.constant 0 : i32
    %c0_i32_1 = arith.constant 0 : i32
    return %c0_i32, %c0_i32_0 : i32, i32
  }
  func.func @transform_12(%arg0: i32) -> (i32, i32, i32) {
    %c0_i32 = arith.constant 0 : i32
    %c0_i32_0 = arith.constant 0 : i32
    %c0_i32_1 = arith.constant 0 : i32
    return %arg0, %c0_i32, %c0_i32_0 : i32, i32, i32
  }
}

</mosaic_0001>

<bundles_post_ra>
// kernel: lenet_forward.1
= control target key start
LH: loop header
LB: loop body
LE: loop exit
PB: predicated region body
PF: predicated region fallthrough
CT: control target
= control target key end

     0   :  { %17 = vsyncpa [#allocation3], 0  ;;  %s4744_s0 = inlined_call_operand.vmem [shape: f32[2,32,32], index: 0, kind: input, shape index: {}]   ;;  %s4745_s1 = inlined_call_operand.vmem [shape: f32[5,32,168], index: 1, kind: input, shape index: {}]   ;;  %s4746_s2 = inlined_call_operand.vmem [shape: f32[1,168], index: 2, kind: input, shape index: {}]   ;;  %s4747_s3 = inlined_call_operand.vmem [shape: f32[14,27], index: 3, kind: input, shape index: {}]   ;;  %s4748_s4 = inlined_call_operand.vmem [shape: f32[5,162,160], index: 4, kind: input, shape index: {}]   ;;  %s4749_s5 = inlined_call_operand.vmem [shape: f32[1,160], index: 5, kind: input, shape index: {}]   ;;  %s4750_s6 = inlined_call_operand.vmem [shape: f32[720,120], index: 6, kind: input, shape index: {}]   ;;  %s4751_s7 = inlined_call_operand.vmem [shape: f32[1,120], index: 7, kind: input, shape index: {}]   ;;  %s4752_s8 = inlined_call_operand.vmem [shape: f32[120,84], index: 8, kind: input, shape index: {}]   ;;  %s4753_s9 = inlined_call_operand.vmem [shape: f32[1,84], index: 9, kind: input, shape index: {}]   ;;  %s4754_s10 = inlined_call_operand.vmem [shape: f32[84,10], index: 10, kind: input, shape index: {}]   ;;  %s4755_s11 = inlined_call_operand.vmem [shape: f32[1,10], index: 11, kind: input, shape index: {}]   ;;  %s4756_s12 = inlined_call_operand.hbm [shape: f32[2,1,10], index: 12, kind: output, shape index: {}]  }
   0x1   :  { %19 = vsyncpa [#allocation3 + $0x1], 0  ;;  %s3183_s21 = smov 0   ;;  %s3185_s22 = smov 0  }
   0x2   :  { %s3187_s23 = smov 0   ;;  %s3189_s24 = smov 0  }
   0x3 LB: > { %4758 = sst [smem:[#allocation5_spill]] %s3103_s23  ;;  %s3204_s25 = sadd.s32 4294967295, %s3107_s24   ;;  %s3107_s24 = sphi %s3189_s24, %s4766_s24   ;;  %s3103_s23 = sphi %s3187_s23, %s4763_s23   ;;  %s3099_s22 = sphi %s3185_s22, %s4765_s22   ;;  %s3095_s21 = sphi %s3183_s21, %s4764_s21  }
   0x4   : > { %s2568_s26 = sadd.s32 4294967294, %s3107_s24   ;;  %s3208_s27 = sadd.s32 1, %s3107_s24  }
   0x5   : > { %s289_s28 = sadd.s32 1, %s3103_s23  ;;  %s286_s29 = ssub.s32 %s3107_s24, %s3208_s27 }
   0x6   : > { %p299_p0 = scmp.ne.s32.totalorder %s3103_s23, %s3099_s22  ;;  %p287_p1 = scmp.eq.s32.totalorder %s286_s29, 0 }
   0x7   : > { %p300_p2 = scmp.eq.s32.totalorder %s3204_s25, 1  ;;  %p305_p3 = scmp.ne.s32.totalorder %s3099_s22, %s3095_s21 }
   0x8   : > { %p306_p4 = scmp.eq.s32.totalorder %s2568_s26, 1  ;;  %p2571_p7 = scmp.ge.s32.totalorder %s3107_s24, 1 }
   0x9   : > { %s3219_s30 = scalar_select %p287_p1, %s3103_s23, %s289_s28  }
   0xa   : > { %p3221_p5 = por %p300_p2, %p299_p0  ;;  %p3225_p6 = por %p306_p4, %p305_p3 }
   0xb   : > { %4759 = sst [smem:[#allocation6_spill]] %s3219_s30  ;;  %p365_p8 = scmp.lt.s32.totalorder %s3107_s24, 3 }
   0xd   : > { %p366_p9 = pnand %p2571_p7, %p365_p8 }
   0xe   : > { %p406_p10 = scmp.lt.s32.totalorder (!%p366_p9), %s3204_s25, 1  ;;  %s3110_s30 = smov (!%p366_p9), 122  }
   0xf   : > { %369 = sbr.rel (%p366_p9) target bundleno = 1785 (0x6f9), region = 68  ;;  %s3111_s29 = smov (!%p366_p9), 112  }
  0x10   : > { %s3112_s19 = smov (!%p366_p9), 16   ;;  %s3113_s28 = smov (!%p366_p9), 32  }
  0x11   : > { %s3115_s15 = smov (!%p366_p9), 64  }
  0x14   : > { %v2581_v0 = vld [vmem:[%s4745_s1 + $0x78] sm:$0xff]  ;;  %v2580_v1 = vld [vmem:[%s4745_s1 + $0x70] sm:$0xff]  ;;  %v2579_v2 = vld [vmem:[%s4745_s1 + $0x68] sm:$0xff]  ;;  %s407_s16 = scalar_select %p406_p10, %s3204_s25, 1  ;;  %vm436_vm0 = vcmask 1046528   ;;  %vm444_vm1 = vcmask 261120  }
  0x15   : > { %477 = vmatprep.subr.mxu0 %v2581_v0  ;;  %2982 = vmatprep.subr.mxu1 %v2581_v0  ;;  %v2578_v3 = vld [vmem:[%s4745_s1 + $0x60] sm:$0xff]  ;;  %v2577_v4 = vld [vmem:[%s4745_s1 + $0x58] sm:$0xff]  ;;  %v2576_v5 = vld [vmem:[%s4745_s1 + $0x50] sm:$0xff]  ;;  %v3109_v18 = vmov 0.0   ;;  %vm648_vm2 = vcmask 1045504   ;;  %vm770_vm3 = vcmask 1044480  }
  0x16   : > { %478 = vmatpush1.msra.mxu0 %v2580_v1  ;;  %2986 = vmatpush1.msra.mxu1 %v2580_v1  ;;  %v2575_v6 = vld [vmem:[%s4745_s1 + $0x48] sm:$0xff]  ;;  %s2825_s26 = sshll.u32 %s407_s16, 5  ;;  %v2574_v7 = vld [vmem:[%s4745_s1 + $0x40] sm:$0xff]  ;;  %v422_v15 = vld [vmem:[%s4745_s1 + $0x38] sm:$0xff]  ;;  %vm892_vm4 = vcmask 1043456   ;;  %vm1057_vm5 = vcmask 998400  }
  0x17   : > { %479 = vmatprep.subr.mxu0 %v2579_v2  ;;  %2983 = vmatprep.subr.mxu1 %v2579_v2  ;;  %s410_s23 = scalar_lea.vmem %s4744_s0, %s2825_s26  ;;  %v2597_v17 = vld [vmem:[%s4745_s1 + $0xb8] sm:$0xff]  ;;  %v421_v20 = vld [vmem:[%s4745_s1 + $0x30] sm:$0xff]  ;;  %v420_v23 = vld [vmem:[%s4745_s1 + $0x28] sm:$0xff]  ;;  %vm1125_vm6 = vcmask 1042432   ;;  %vm1118_vm7 = vcmask 220160   ;;  %vm1311_vm8 = vcmask 1041408  }
  0x18   : > { %480 = vmatpush1.msra.mxu0 %v2578_v3  ;;  %2987 = vmatpush1.msra.mxu1 %v2578_v3  ;;  %v3260_v8 = vld [vmem:[%s410_s23] sm:$0xff]  ;;  %v3262_v9 = vld [vmem:[%s410_s23 + $0x8] sm:$0xff]  ;;  %v3264_v10 = vld [vmem:[%s410_s23 + $0x10] sm:$0xff]  ;;  %vm1306_vm9 = vcmask 277504   ;;  %vm1940_vm10 = vcmask 916480   ;;  %vm1977_vm11 = vcmask 130048  }
  0x19   : > { %481 = vmatprep.subr.mxu0 %v2577_v4  ;;  %2984 = vmatprep.subr.mxu1 %v2577_v4  ;;  %v437_v11 = vrot.slane %v3260_v8, 1  ;;  %v438_v12 = vrot.slane %v3262_v9, 1  ;;  %v3268_v13 = vld [vmem:[%s410_s23 + $0x18] sm:$0xff]  ;;  %v440_v14 = vrot.slane %v3264_v10, 1  ;;  %v2596_v21 = vld [vmem:[%s4745_s1 + $0xb0] sm:$0xff]  ;;  %v2595_v24 = vld [vmem:[%s4745_s1 + $0xa8] sm:$0xff] }
  0x1a   : > { %482 = vmatpush1.msra.mxu0 %v2576_v5  ;;  %2988 = vmatpush1.msra.mxu1 %v2576_v5  ;;  %v442_v16 = vrot.slane %v3268_v13, 1  ;;  %v419_v25 = vld [vmem:[%s4745_s1 + $0x20] sm:$0xff]  ;;  %v418_v28 = vld [vmem:[%s4745_s1 + $0x18] sm:$0xff]  ;;  %v417_v30 = vld [vmem:[%s4745_s1 + $0x10] sm:$0xff]  ;;  %v649_v32 = vrot.slane %v3260_v8, 2  ;;  %v650_v33 = vrot.slane %v3262_v9, 2 }
  0x1b   : > { %483 = vmatprep.subr.mxu0 %v2575_v6  ;;  %2985 = vmatprep.subr.mxu1 %v2575_v6  ;;  %v439_v19 = vsel %vm436_vm0, %v437_v11, %v438_v12  ;;  %v2594_v26 = vld [vmem:[%s4745_s1 + $0xa0] sm:$0xff]  ;;  %v441_v27 = vsel %vm436_vm0, %v438_v12, %v440_v14  ;;  %v2593_v29 = vld [vmem:[%s4745_s1 + $0x98] sm:$0xff]  ;;  %v2592_v31 = vld [vmem:[%s4745_s1 + $0x90] sm:$0xff]  ;;  %v652_v39 = vrot.slane %v3264_v10, 2  ;;  %v654_v45 = vrot.slane %v3268_v13, 2 }
  0x1c   : > { %484 = vmatpush1.msra.mxu0 %v2574_v7  ;;  %2989 = vmatpush1.msra.mxu1 %v2574_v7  ;;  %v443_v22 = vsel %vm436_vm0, %v440_v14, %v442_v16  ;;  %v416_v34 = vld [vmem:[%s4745_s1 + $0x8] sm:$0xff]  ;;  %v415_v36 = vld [vmem:[%s4745_s1] sm:$0xff]  ;;  %v651_v38 = vsel %vm648_vm2, %v649_v32, %v650_v33  ;;  %v2609_v40 = vld [vmem:[%s4745_s1 + $0xf8] sm:$0xff]  ;;  %v771_v55 = vrot.slane %v3260_v8, 3  ;;  %v772_v56 = vrot.slane %v3262_v9, 3 }
  0x1d   : > { %517 = vmatprep.mubr.f32.mxu0 %v3109_v18  ;;  %529 = vmatprep.mubr.f32.mxu1 %v3109_v18  ;;  %v2591_v35 = vld [vmem:[%s4745_s1 + $0x88] sm:$0xff]  ;;  %v2590_v37 = vld [vmem:[%s4745_s1 + $0x80] sm:$0xff]  ;;  %v2621_v41 = vld [vmem:[%s4745_s1 + $0x138] sm:$0xff]  ;;  %v653_v44 = vsel %vm648_vm2, %v650_v33, %v652_v39  ;;  %v655_v50 = vsel %vm648_vm2, %v652_v39, %v654_v45  ;;  %v893_v57 = vrot.slane %v3260_v8, 4  ;;  %v894_v58 = vrot.slane %v3262_v9, 4 }
  0x1e   : > { %2582 = vmatmul.mubr.msk.f32.vlgmr.msra.gmra.mxu0 %vm444_vm1, %v439_v19  ;;  %574 = vmatprep.subr.mxu1 %v422_v15  ;;  %v2608_v42 = vld [vmem:[%s4745_s1 + $0xf0] sm:$0xff]  ;;  %v2607_v46 = vld [vmem:[%s4745_s1 + $0xe8] sm:$0xff]  ;;  %v2606_v48 = vld [vmem:[%s4745_s1 + $0xe0] sm:$0xff]  ;;  %v773_v63 = vsel %vm770_vm3, %v771_v55, %v772_v56  ;;  %v774_v1 = vrot.slane %v3264_v10, 3  ;;  %v896_v2 = vrot.slane %v3264_v10, 4  ;;  %v776_v5 = vrot.slane %v3268_v13, 3 }
  0x1f   : > { %2584 = vmatmul.mubr.msk.f32.vlgmr.msra.gmra.mxu1 %vm444_vm1, %v443_v22  ;;  %688 = vmatprep.subr.mxu0 %v2597_v17  ;;  %v2620_v43 = vld [vmem:[%s4745_s1 + $0x130] sm:$0xff]  ;;  %v2619_v47 = vld [vmem:[%s4745_s1 + $0x128] sm:$0xff]  ;;  %v2618_v49 = vld [vmem:[%s4745_s1 + $0x120] sm:$0xff]  ;;  %v895_v0 = vsel %vm892_vm4, %v893_v57, %v894_v58  ;;  %v898_v6 = vrot.slane %v3268_v13, 4  ;;  %vm1996_vm12 = vcmask 392192   ;;  %vm2006_vm13 = vcmask 523264  }
  0x20   : > { %575 = vmatpush1.msra.mxu1 %v421_v20  ;;  %689 = vmatpush1.msra.mxu0 %v2596_v21  ;;  %v2605_v51 = vld [vmem:[%s4745_s1 + $0xd8] sm:$0xff]  ;;  %v2604_v53 = vld [vmem:[%s4745_s1 + $0xd0] sm:$0xff]  ;;  %v2603_v59 = vld [vmem:[%s4745_s1 + $0xc8] sm:$0xff]  ;;  %v775_v3 = vsel %vm770_vm3, %v772_v56, %v774_v1  ;;  %v897_v4 = vsel %vm892_vm4, %v894_v58, %v896_v2  ;;  %v777_v7 = vsel %vm770_vm3, %v774_v1, %v776_v5  ;;  %vm2104_vm14 = vcmask 654336  }
  0x21   : > { %576 = vmatprep.subr.mxu1 %v420_v23  ;;  %690 = vmatprep.subr.mxu0 %v2595_v24  ;;  %v2617_v52 = vld [vmem:[%s4745_s1 + $0x118] sm:$0xff]  ;;  %v2616_v54 = vld [vmem:[%s4745_s1 + $0x110] sm:$0xff]  ;;  %v2615_v60 = vld [vmem:[%s4745_s1 + $0x108] sm:$0xff]  ;;  %vm3116_vm15 = vmmov 0  }
  0x22   : > { %523 = vmatprep.mubr.f32.mxu0 %v3109_v18  ;;  %535 = vmatprep.mubr.f32.mxu1 %v3109_v18  ;;  %v2602_v61 = vld [vmem:[%s4745_s1 + $0xc0] sm:$0xff] }
  0x23   : > { %577 = vmatpush1.msra.mxu1 %v419_v25  ;;  %691 = vmatpush1.msra.mxu0 %v2594_v26  ;;  %v2614_v62 = vld [vmem:[%s4745_s1 + $0x100] sm:$0xff] }
  0x24   : > { %2583 = vmatmul.mubr.msk.f32.gmra.mxu0 %vm444_vm1, %v441_v27  ;;  %2585 = vmatmul.mubr.msk.f32.gmra.mxu1 %vm444_vm1, %v442_v16 }
  0x25   : > { %578 = vmatprep.subr.mxu1 %v418_v28  ;;  %692 = vmatprep.subr.mxu0 %v2593_v29 }
  0x26   : > { %579 = vmatpush1.msra.mxu1 %v417_v30  ;;  %693 = vmatpush1.msra.mxu0 %v2592_v31 }
  0x27   : > { %580 = vmatprep.subr.mxu1 %v416_v34  ;;  %694 = vmatprep.subr.mxu0 %v2591_v35  ;;  %v1007_v34 = vlaneseq }
  0x28   : > { %581 = vmatpush1.msra.mxu1 %v415_v36  ;;  %614 = vmatprep.mubr.f32.mxu1 %v3109_v18 }
  0x29   : > { %695 = vmatpush1.msra.mxu0 %v2590_v37  ;;  %728 = vmatprep.mubr.f32.mxu0 %v3109_v18 }
  0x2a   : > { %2586 = vmatmul.mubr.msk.f32.vlgmr.msra.gmra.mxu1 %vm444_vm1, %v3260_v8  ;;  %2598 = vmatmul.mubr.msk.f32.vlgmr.msra.gmra.mxu0 %vm444_vm1, %v651_v38  ;;  %v899_v8 = vsel %vm892_vm4, %v896_v2, %v898_v6 }
  0x2b   : > { %620 = vmatprep.mubr.f32.mxu1 %v3109_v18  ;;  %734 = vmatprep.mubr.f32.mxu0 %v3109_v18 }
  0x2c   : > { %810 = vmatprep.subr.mxu1 %v2609_v40  ;;  %932 = vmatprep.subr.mxu0 %v2621_v41  ;;  %v3441_v40 = vshrl.u32 %v1007_v34, 7 }
  0x2d   : > { %811 = vmatpush1.msra.mxu1 %v2608_v42  ;;  %933 = vmatpush1.msra.mxu0 %v2620_v43 }
  0x2e   : > { %2587 = vmatmul.mubr.msk.f32.gmra.mxu1 %vm444_vm1, %v3262_v9  ;;  %2599 = vmatmul.mubr.msk.f32.gmra.mxu0 %vm444_vm1, %v653_v44 }
  0x2f   : > { %626 = vmatprep.mubr.f32.mxu1 %v3109_v18  ;;  %740 = vmatprep.mubr.f32.mxu0 %v3109_v18 }
  0x30   : > { %812 = vmatprep.subr.mxu1 %v2607_v46  ;;  %934 = vmatprep.subr.mxu0 %v2619_v47 }
  0x31   : > { %813 = vmatpush1.msra.mxu1 %v2606_v48  ;;  %935 = vmatpush1.msra.mxu0 %v2618_v49  ;;  %v1009_v49 = vsub.s32 0, %v3441_v40 }
  0x32   : > { %2588 = vmatmul.mubr.msk.f32.gmra.mxu1 %vm444_vm1, %v3264_v10  ;;  %2600 = vmatmul.mubr.msk.f32.gmra.mxu0 %vm444_vm1, %v655_v50 }
  0x33   : > { %632 = vmatprep.mubr.f32.mxu1 %v3109_v18  ;;  %746 = vmatprep.mubr.f32.mxu0 %v3109_v18 }
  0x34   : > { %814 = vmatprep.subr.mxu1 %v2605_v51  ;;  %936 = vmatprep.subr.mxu0 %v2617_v52 }
  0x35   : > { %815 = vmatpush1.msra.mxu1 %v2604_v53  ;;  %937 = vmatpush1.msra.mxu0 %v2616_v54  ;;  %v1005_v53 = vld [vmem:[%s4746_s2] sm:$0x3]  ;;  %v1013_v54 = vsub.s32 1, %v3441_v40 }
  0x36   : > { %2589 = vmatmul.mubr.msk.f32.gmra.mxu1 %vm444_vm1, %v3268_v13  ;;  %2601 = vmatmul.mubr.msk.f32.gmra.mxu0 %vm444_vm1, %v654_v45 }
  0x37   : > { %816 = vmatprep.subr.mxu1 %v2603_v59  ;;  %938 = vmatprep.subr.mxu0 %v2615_v60 }
  0x38   : > { %817 = vmatpush1.msra.mxu1 %v2602_v61  ;;  %850 = vmatprep.mubr.f32.mxu1 %v3109_v18 }
  0x39   : > { %939 = vmatpush1.msra.mxu0 %v2614_v62  ;;  %972 = vmatprep.mubr.f32.mxu0 %v3109_v18 }
  0x3a   : > { %2610 = vmatmul.mubr.msk.f32.vlgmr.msra.gmra.mxu1 %vm444_vm1, %v773_v63  ;;  %2622 = vmatmul.mubr.msk.f32.vlgmr.msra.gmra.mxu0 %vm444_vm1, %v895_v0  ;;  %v1010_v0 = vrot.slane %v1005_v53, %v1009_v49 }
  0x3b   : > { %856 = vmatprep.mubr.f32.mxu1 %v3109_v18  ;;  %978 = vmatprep.mubr.f32.mxu0 %v3109_v18 }
  0x3e   : > { %2611 = vmatmul.mubr.msk.f32.gmra.mxu1 %vm444_vm1, %v775_v3  ;;  %2623 = vmatmul.mubr.msk.f32.gmra.mxu0 %vm444_vm1, %v897_v4 }
  0x3f   : > { %862 = vmatprep.mubr.f32.mxu1 %v3109_v18  ;;  %984 = vmatprep.mubr.f32.mxu0 %v3109_v18 }
  0x42   : > { %2612 = vmatmul.mubr.msk.f32.gmra.mxu1 %vm444_vm1, %v777_v7  ;;  %2624 = vmatmul.mubr.msk.f32.gmra.mxu0 %vm444_vm1, %v899_v8 }
  0x43   : > { %868 = vmatprep.mubr.f32.mxu1 %v3109_v18  ;;  %990 = vmatprep.mubr.f32.mxu0 %v3109_v18 }
  0x46   : > { %2613 = vmatmul.mubr.msk.f32.gmra.mxu1 %vm444_vm1, %v776_v5  ;;  %2625 = vmatmul.mubr.msk.f32.gmra.mxu0 %vm444_vm1, %v898_v6  ;;  %v1014_v6 = vrot.slane %v1005_v53, %v1013_v54  ;;  %v2652_v53 = vld [vmem:[%s4748_s4 + $0x200] sm:$0xff] }
  0x47   : > { %1196 = vmatprep.mubr.f32.mxu1 %v3109_v18 }
  0xde   : > { %v519_v9 = vpop.f32.mrf.mxu0 }
  0xdf   : > { %v531_v10 = vpop.f32.mrf.mxu1 }
  0xe0   : > { %v521_v11 = vpop.f32.mrf.mxu0 }
  0xe1   : > { %v533_v12 = vpop.f32.mrf.mxu1 }
  0xe4   : > { %v525_v13 = vpop.f32.mrf.mxu0  ;;  %v537_v14 = vpop.f32.mrf.mxu1 }
  0xe6   : > { %v527_v15 = vpop.f32.mrf.mxu0  ;;  %v539_v16 = vpop.f32.mrf.mxu1 }
  0xea   : > { %v616_v17 = vpop.f32.mrf.mxu1  ;;  %v3437_v19 = vpop.f32.mrf.mxu0 }
  0xeb   : > { %v617_v3 = vadd.f32 %v616_v17, %v519_v9 }
  0xec   : > { %v618_v20 = vpop.f32.mrf.mxu1  ;;  %v732_v21 = vpop.f32.mrf.mxu0 }
  0xed   : > { %v619_v50 = vadd.f32 %v618_v20, %v521_v11 }
  0xee   : > { %v622_v22 = vpop.f32.mrf.mxu1  ;;  %v736_v23 = vpop.f32.mrf.mxu0 }
  0xef   : > { %v623_v51 = vadd.f32 %v622_v22, %v525_v13  ;;  %v754_v4 = vadd.f32 %v732_v21, %v619_v50  ;;  %v753_v21 = vadd.f32 %v3437_v19, %v617_v3  ;;  %v2655_v50 = vld [vmem:[%s4748_s4 + $0x218] sm:$0xff] }
  0xf0   : > { %v624_v24 = vpop.f32.mrf.mxu1  ;;  %v738_v25 = vpop.f32.mrf.mxu0  ;;  %v2639_v3 = vld [vmem:[%s4748_s4 + $0x198] sm:$0xff] }
  0xf1   : > { %v625_v41 = vadd.f32 %v624_v24, %v527_v15  ;;  %v755_v5 = vadd.f32 %v736_v23, %v623_v51  ;;  %v2654_v51 = vld [vmem:[%s4748_s4 + $0x210] sm:$0xff] }
  0xf2   : > { %v628_v26 = vpop.f32.mrf.mxu1  ;;  %v742_v27 = vpop.f32.mrf.mxu0 }
  0xf3   : > { %v629_v39 = vadd.f32 %v628_v26, %v531_v10  ;;  %v756_v52 = vadd.f32 %v738_v25, %v625_v41 }
  0xf4   : > { %v630_v28 = vpop.f32.mrf.mxu1  ;;  %v744_v29 = vpop.f32.mrf.mxu0 }
  0xf5   : > { %v631_v44 = vadd.f32 %v630_v28, %v533_v12  ;;  %v757_v47 = vadd.f32 %v742_v27, %v629_v39 }
  0xf6   : > { %v634_v30 = vpop.f32.mrf.mxu1  ;;  %v748_v31 = vpop.f32.mrf.mxu0 }
  0xf7   : > { %v635_v48 = vadd.f32 %v634_v30, %v537_v14  ;;  %v758_v57 = vadd.f32 %v744_v29, %v631_v44  ;;  %v2660_v44 = vld [vmem:[%s4748_s4 + $0x240] sm:$0xff] }
  0xf8   : > { %v636_v32 = vpop.f32.mrf.mxu1  ;;  %v750_v33 = vpop.f32.mrf.mxu0 }
  0xf9   : > { %v637_v58 = vadd.f32 %v636_v32, %v539_v16  ;;  %v759_v63 = vadd.f32 %v748_v31, %v635_v48  ;;  %v2656_v48 = vld [vmem:[%s4748_s4 + $0x220] sm:$0xff] }
  0xfa   : > { %v852_v35 = vpop.f32.mrf.mxu1  ;;  %v3439_v36 = vpop.f32.mrf.mxu0 }
  0xfb   : > { %v760_v10 = vadd.f32 %v750_v33, %v637_v58  ;;  %v875_v27 = vadd.f32 %v852_v35, %v753_v21  ;;  %v2648_v58 = vld [vmem:[%s4748_s4 + $0x1e0] sm:$0xff] }
  0xfc   : > { %v854_v37 = vpop.f32.mrf.mxu1  ;;  %v976_v38 = vpop.f32.mrf.mxu0 }
  0xfd   : > { %v876_v14 = vadd.f32 %v854_v37, %v754_v4  ;;  %v997_v19 = vadd.f32 %v3439_v36, %v875_v27  ;;  %v2638_v4 = vld [vmem:[%s4748_s4 + $0x190] sm:$0xff] }
  0xfe   : > { %v858_v42 = vpop.f32.mrf.mxu1  ;;  %v980_v43 = vpop.f32.mrf.mxu0 }
  0xff   : > { %v877_v15 = vadd.f32 %v858_v42, %v755_v5  ;;  %v998_v28 = vadd.f32 %v976_v38, %v876_v14  ;;  %v3483_v39 = vadd.f32 %v1010_v0, %v997_v19  ;;  %v2637_v5 = vld [vmem:[%s4748_s4 + $0x188] sm:$0xff]  ;;  %v2630_v14 = vld [vmem:[%s4748_s4 + $0x150] sm:$0xff] }
 0x100   : > { %v860_v45 = vpop.f32.mrf.mxu1  ;;  %v982_v46 = vpop.f32.mrf.mxu0 }
 0x101   : > { %v878_v60 = vadd.f32 %v860_v45, %v756_v52  ;;  %v999_v29 = vadd.f32 %v980_v43, %v877_v15  ;;  %v3473_v34 = vadd.f32 %v1014_v6, %v998_v28  ;;  %v1025_v42 = vmax.f32 %v3483_v39, 0.0  ;;  %v2661_v43 = vld [vmem:[%s4748_s4 + $0x248] sm:$0xff]  ;;  %v2659_v45 = vld [vmem:[%s4748_s4 + $0x238] sm:$0xff] }
 0x102   : > { %v864_v55 = vpop.f32.mrf.mxu1  ;;  %v986_v56 = vpop.f32.mrf.mxu0  ;;  %1318 = vmatprep.subr.mxu0 %v2661_v43  ;;  %v2653_v52 = vld [vmem:[%s4748_s4 + $0x208] sm:$0xff]  ;;  %v1240_v39 = vld [vmem:[%s4748_s4 + $0xf8] sm:$0xff] }
 0x103   : > { %v879_v59 = vadd.f32 %v864_v55, %v757_v47  ;;  %v1000_v16 = vadd.f32 %v982_v46, %v878_v60  ;;  %v3475_v35 = vadd.f32 %v1010_v0, %v999_v29  ;;  %v1026_v41 = vmax.f32 %v3473_v34, 0.0  ;;  %1319 = vmatpush1.msra.mxu0 %v2660_v44  ;;  %v2658_v46 = vld [vmem:[%s4748_s4 + $0x230] sm:$0xff]  ;;  %v2657_v47 = vld [vmem:[%s4748_s4 + $0x228] sm:$0xff]  ;;  %v2651_v55 = vld [vmem:[%s4748_s4 + $0x1f8] sm:$0xff] }
 0x104   : > { %v866_v61 = vpop.f32.mrf.mxu1  ;;  %v988_v62 = vpop.f32.mrf.mxu0  ;;  %1320 = vmatprep.subr.mxu0 %v2659_v45  ;;  %v2646_v60 = vld [vmem:[%s4748_s4 + $0x1d0] sm:$0xff] }
 0x105   : > { %v1001_v1 = vadd.f32 %v986_v56, %v879_v59  ;;  %v880_v2 = vadd.f32 %v866_v61, %v758_v57  ;;  %v3462_v30 = vadd.f32 %v1014_v6, %v1000_v16  ;;  %v1027_v36 = vmax.f32 %v3475_v35, 0.0  ;;  %1321 = vmatpush1.msra.mxu0 %v2658_v46  ;;  %v2650_v56 = vld [vmem:[%s4748_s4 + $0x1f0] sm:$0xff]  ;;  %v2649_v57 = vld [vmem:[%s4748_s4 + $0x1e8] sm:$0xff]  ;;  %v2647_v59 = vld [vmem:[%s4748_s4 + $0x1d8] sm:$0xff] }
 0x106   : > { %v870_v7 = vpop.f32.mrf.mxu1  ;;  %v992_v8 = vpop.f32.mrf.mxu0  ;;  %1322 = vmatprep.subr.mxu0 %v2657_v47  ;;  %v2645_v61 = vld [vmem:[%s4748_s4 + $0x1c8] sm:$0xff] }
 0x107   : > { %v1002_v11 = vadd.f32 %v988_v62, %v880_v2  ;;  %v881_v12 = vadd.f32 %v870_v7, %v759_v63  ;;  %v3452_v13 = vadd.f32 %v1010_v0, %v1001_v1  ;;  %v1028_v37 = vmax.f32 %v3462_v30, 0.0  ;;  %1323 = vmatpush1.msra.mxu0 %v2656_v48  ;;  %v2644_v62 = vld [vmem:[%s4748_s4 + $0x1c0] sm:$0xff]  ;;  %v2643_v63 = vld [vmem:[%s4748_s4 + $0x1b8] sm:$0xff]  ;;  %v2641_v1 = vld [vmem:[%s4748_s4 + $0x1a8] sm:$0xff] }
 0x108   : > { %v872_v20 = vpop.f32.mrf.mxu1  ;;  %v994_v23 = vpop.f32.mrf.mxu0  ;;  %1324 = vmatprep.subr.mxu0 %v2655_v50  ;;  %v2640_v2 = vld [vmem:[%s4748_s4 + $0x1a0] sm:$0xff]  ;;  %v2635_v7 = vld [vmem:[%s4748_s4 + $0x178] sm:$0xff] }
 0x109   : > { %v3454_v22 = vadd.f32 %v1014_v6, %v1002_v11  ;;  %v1003_v24 = vadd.f32 %v992_v8, %v881_v12  ;;  %v882_v9 = vadd.f32 %v872_v20, %v760_v10  ;;  %v1029_v17 = vmax.f32 %v3452_v13, 0.0  ;;  %1325 = vmatpush1.msra.mxu0 %v2654_v51  ;;  %v2634_v8 = vld [vmem:[%s4748_s4 + $0x170] sm:$0xff]  ;;  %v2633_v10 = vld [vmem:[%s4748_s4 + $0x168] sm:$0xff]  ;;  %v2632_v11 = vld [vmem:[%s4748_s4 + $0x160] sm:$0xff] }
 0x10a   : > { %1326 = vmatprep.subr.mxu0 %v2653_v52  ;;  %v2631_v12 = vld [vmem:[%s4748_s4 + $0x158] sm:$0xff] }
 0x10b   : > { %v1004_v25 = vadd.f32 %v994_v23, %v882_v9  ;;  %1049 = vrot.lane.b32.xlu1 %v1029_v17, %s3110_s30  ;;  %v3460_v26 = vadd.f32 %v1010_v0, %v1003_v24  ;;  %v1030_v31 = vmax.f32 %v3454_v22, 0.0  ;;  %1327 = vmatpush1.msra.mxu0 %v2652_v53  ;;  %v2642_v0 = vld [vmem:[%s4748_s4 + $0x1b0] sm:$0xff] }
 0x10c   : > { %1328 = vmatprep.subr.mxu0 %v2651_v55 }
 0x10d   : > { %v3465_v32 = vadd.f32 %v1014_v6, %v1004_v25  ;;  %v1031_v33 = vmax.f32 %v3460_v26, 0.0  ;;  %1329 = vmatpush1.msra.mxu0 %v2650_v56  ;;  %v2636_v6 = vld [vmem:[%s4748_s4 + $0x180] sm:$0xff] }
 0x10e   : > { %1330 = vmatprep.subr.mxu0 %v2649_v57 }
 0x10f   : > { %1051 = vrot.lane.b32.xlu1 %v1030_v31, %s3110_s30  ;;  %1053 = vrot.lane.b32.xlu0 %v1031_v33, %s3110_s30  ;;  %v1032_v38 = vmax.f32 %v3465_v32, 0.0 }
 0x110   : > { %1331 = vmatpush1.msra.mxu0 %v2648_v58 }
 0x111   : > { %1332 = vmatprep.subr.mxu0 %v2647_v59 }
 0x112   : > { %1333 = vmatpush1.msra.mxu0 %v2646_v60 }
 0x113   : > { %1055 = vrot.lane.b32.xlu0 %v1032_v38, %s3110_s30  ;;  %1047 = vrot.lane.b32.xlu1 %v1028_v37, %s3110_s30 }
 0x114   : > { %1334 = vmatprep.subr.mxu0 %v2645_v61  ;;  %v1116_v61 = vld [vmem:[%s4747_s3] sm:$0xff] }
 0x115   : > { %1335 = vmatpush1.msra.mxu0 %v2644_v62  ;;  %v1238_v62 = vld [vmem:[%s4748_s4 + $0xe8] sm:$0xff] }
 0x116   : > { %1336 = vmatprep.subr.mxu0 %v2643_v63  ;;  %v1237_v63 = vld [vmem:[%s4748_s4 + $0xe0] sm:$0xff] }
 0x117   : > { %1045 = vrot.lane.b32.xlu0 %v1027_v36, %s3110_s30  ;;  %1043 = vrot.lane.b32.xlu1 %v1026_v41, %s3110_s30 }
 0x118   : > { %1337 = vmatpush1.msra.mxu0 %v2642_v0  ;;  %v1117_v0 = vld [vmem:[%s4747_s3 + $0x8] sm:$0x3f] }
 0x119   : > { %1338 = vmatprep.subr.mxu0 %v2641_v1  ;;  %v1236_v1 = vld [vmem:[%s4748_s4 + $0xd8] sm:$0xff] }
 0x11a   : > { %1339 = vmatpush1.msra.mxu0 %v2640_v2  ;;  %v1235_v2 = vld [vmem:[%s4748_s4 + $0xd0] sm:$0xff] }
 0x11b   : > { %1041 = vrot.lane.b32.xlu0 %v1025_v42, %s3110_s30  ;;  %1340 = vmatprep.subr.mxu0 %v2639_v3  ;;  %v1234_v3 = vld [vmem:[%s4748_s4 + $0xc8] sm:$0xff]  ;;  %s2822_s30 = sshll.u32 %s3204_s25, 4  ;;  %s3117_s25 = smov [#allocation2]  }
 0x11c   : > { %1341 = vmatpush1.msra.mxu0 %v2638_v4  ;;  %v1233_v4 = vld [vmem:[%s4748_s4 + $0xc0] sm:$0xff] }
 0x11d   : > { %1342 = vmatprep.subr.mxu0 %v2637_v5  ;;  %v1232_v5 = vld [vmem:[%s4748_s4 + $0xb8] sm:$0xff] }
 0x11e   : > { %1343 = vmatpush1.msra.mxu0 %v2636_v6  ;;  %v1231_v6 = vld [vmem:[%s4748_s4 + $0xb0] sm:$0xff] }
 0x11f   : > { %1344 = vmatprep.subr.mxu0 %v2635_v7  ;;  %v1230_v7 = vld [vmem:[%s4748_s4 + $0xa8] sm:$0xff] }
 0x120   : > { %1345 = vmatpush1.msra.mxu0 %v2634_v8  ;;  %v1229_v8 = vld [vmem:[%s4748_s4 + $0xa0] sm:$0xff] }
 0x121   : > { %1346 = vmatprep.subr.mxu0 %v2633_v10  ;;  %v1228_v10 = vld [vmem:[%s4748_s4 + $0x98] sm:$0xff] }
 0x122   : > { %1347 = vmatpush1.msra.mxu0 %v2632_v11  ;;  %v1227_v11 = vld [vmem:[%s4748_s4 + $0x90] sm:$0xff] }
 0x123   : > { %1348 = vmatprep.subr.mxu0 %v2631_v12  ;;  %v1226_v12 = vld [vmem:[%s4748_s4 + $0x88] sm:$0xff] }
 0x124   : > { %1349 = vmatpush1.msra.mxu0 %v2630_v14  ;;  %v1225_v14 = vld [vmem:[%s4748_s4 + $0x80] sm:$0xff] }
 0x17d   : > { %v1050_v15 = vpop.permute.xlu1 %1049 }
 0x181   : > { %v1052_v16 = vpop.permute.xlu1 %1051  ;;  %v1054_v20 = vpop.permute.xlu0 %1053 }
 0x182   : > { %v1060_v24 = vsel %vm1057_vm5, %v1050_v15, %v1052_v16  ;;  %v1075_v9 = vmax.f32 %v1030_v31, %v1052_v16  ;;  %v1224_v15 = vld [vmem:[%s4748_s4 + $0x78] sm:$0xff]  ;;  %v1223_v16 = vld [vmem:[%s4748_s4 + $0x70] sm:$0xff] }
 0x183   : > { %v1074_v25 = vmax.f32 %v1029_v17, %v1060_v24  ;;  %v1221_v24 = vld [vmem:[%s4748_s4 + $0x60] sm:$0xff] }
 0x184   : > { %v1094_v22 = vrot.slane %v1075_v9, 1 }
 0x185   : > { %v1056_v21 = vpop.permute.xlu0 %1055  ;;  %v1048_v23 = vpop.permute.xlu1 %1047  ;;  %v1092_v13 = vrot.slane %v1074_v25, 1 }
 0x186   : > { %v1061_v27 = vsel %vm1057_vm5, %v1054_v20, %v1056_v21  ;;  %v1077_v28 = vmax.f32 %v1032_v38, %v1056_v21  ;;  %v1073_v29 = vmax.f32 %v1028_v37, %v1048_v23  ;;  %v1222_v20 = vld [vmem:[%s4748_s4 + $0x68] sm:$0xff]  ;;  %v1219_v21 = vld [vmem:[%s4748_s4 + $0x50] sm:$0xff] }
 0x187   : > { %v1076_v19 = vmax.f32 %v1031_v33, %v1061_v27  ;;  %v1216_v27 = vld [vmem:[%s4748_s4 + $0x38] sm:$0xff] }
 0x188   : > { %v1098_v43 = vrot.slane %v1077_v28, 1  ;;  %v1090_v44 = vrot.slane %v1073_v29, 1 }
 0x189   : > { %v1096_v31 = vrot.slane %v1076_v19, 1  ;;  %v1046_v45 = vpop.permute.xlu0 %1045  ;;  %v1044_v46 = vpop.permute.xlu1 %1043 }
 0x18a   : > { %v1115_v17 = vmax.f32 %v1077_v28, %v1098_v43  ;;  %v1059_v47 = vsel %vm1057_vm5, %v1046_v45, %v1048_v23  ;;  %v1071_v32 = vmax.f32 %v1026_v41, %v1044_v46  ;;  %v1095_v30 = vsel %vm436_vm0, %v1090_v44, %v1094_v22  ;;  %v1218_v23 = vld [vmem:[%s4748_s4 + $0x48] sm:$0xff]  ;;  %v1215_v28 = vld [vmem:[%s4748_s4 + $0x30] sm:$0xff] }
 0x18b   : > { %v1114_v38 = vmax.f32 %v1076_v19, %v1096_v31  ;;  %v1072_v26 = vmax.f32 %v1027_v36, %v1059_v47  ;;  %v1099_v33 = vsel %vm436_vm0, %v1094_v22, %v1098_v43  ;;  %v1097_v50 = vsel %vm436_vm0, %v1092_v13, %v1096_v31  ;;  %v1213_v19 = vld [vmem:[%s4748_s4 + $0x20] sm:$0xff]  ;;  %v1212_v43 = vld [vmem:[%s4748_s4 + $0x18] sm:$0xff]  ;;  %v1210_v22 = vld [vmem:[%s4748_s4 + $0x8] sm:$0xff] }
 0x18c   : > { %v1089_v37 = vrot.slane %v1071_v32, 1  ;;  %2626 = vmatprep.subr.msk.mxu1 %vm1125_vm6, %v1115_v17  ;;  %v1113_v48 = vmax.f32 %v1075_v9, %v1099_v33  ;;  %v1112_v53 = vmax.f32 %v1074_v25, %v1097_v50  ;;  %v1111_v55 = vmax.f32 %v1073_v29, %v1095_v30  ;;  %v1220_v9 = vld [vmem:[%s4748_s4 + $0x58] sm:$0xff]  ;;  %v1217_v25 = vld [vmem:[%s4748_s4 + $0x40] sm:$0xff]  ;;  %v1214_v29 = vld [vmem:[%s4748_s4 + $0x28] sm:$0xff] }
 0x18d   : > { %v1087_v51 = vrot.slane %v1072_v26, 1  ;;  %2627 = vmatpush1.msk.msra.mxu1 %vm1125_vm6, %v1114_v38  ;;  %v1042_v52 = vpop.permute.xlu0 %1041  ;;  %v1209_v31 = vld [vmem:[%s4748_s4] sm:$0xff]  ;;  %v1250_v45 = vld [vmem:[%s4748_s4 + $0x148] sm:$0x3]  ;;  %v1247_v17 = vld [vmem:[%s4748_s4 + $0x130] sm:$0xff] }
 0x18e   : > { %v1091_v34 = vsel %vm436_vm0, %v1089_v37, %v1090_v44  ;;  %v1058_v41 = vsel %vm1057_vm5, %v1042_v52, %v1044_v46  ;;  %1158 = vmatprep.subr.mxu1 %v1113_v48  ;;  %v1211_v44 = vld [vmem:[%s4748_s4 + $0x10] sm:$0xff]  ;;  %v1249_v46 = vld [vmem:[%s4748_s4 + $0x140] sm:$0x3]  ;;  %v1246_v47 = vld [vmem:[%s4748_s4 + $0x128] sm:$0xff] }
 0x18f   : > { %v1093_v35 = vsel %vm436_vm0, %v1087_v51, %v1092_v13  ;;  %v1070_v36 = vmax.f32 %v1025_v42, %v1058_v41  ;;  %1159 = vmatpush1.msra.mxu1 %v1112_v53  ;;  %v1109_v57 = vmax.f32 %v1071_v32, %v1091_v34  ;;  %v1239_v42 = vld [vmem:[%s4748_s4 + $0xf0] sm:$0xff]  ;;  %v1248_v13 = vld [vmem:[%s4748_s4 + $0x138] sm:$0xff]  ;;  %v1245_v32 = vld [vmem:[%s4748_s4 + $0x120] sm:$0xff] }
 0x190   : > { %v1110_v56 = vmax.f32 %v1072_v26, %v1093_v35  ;;  %1160 = vmatprep.subr.mxu1 %v1111_v55  ;;  %v1244_v38 = vld [vmem:[%s4748_s4 + $0x118] sm:$0xff]  ;;  %v1243_v26 = vld [vmem:[%s4748_s4 + $0x110] sm:$0xff]  ;;  %v1242_v37 = vld [vmem:[%s4748_s4 + $0x108] sm:$0xff] }
 0x191   : > { %v1086_v58 = vrot.slane %v1070_v36, 1  ;;  %v2671_v30 = vld [vmem:[%s4748_s4 + $0x298] sm:$0x3]  ;;  %v2670_v33 = vld [vmem:[%s4748_s4 + $0x290] sm:$0x3]  ;;  %v2669_v48 = vld [vmem:[%s4748_s4 + $0x288] sm:$0xff] }
 0x192   : > { %1161 = vmatpush1.msra.mxu1 %v1110_v56  ;;  %2672 = vmatprep.subr.msk.mxu0 %vm1311_vm8, %v2671_v30  ;;  %v1241_v50 = vld [vmem:[%s4748_s4 + $0x100] sm:$0xff]  ;;  %v2757_v52 = vld [vmem:[%s4748_s4 + $0x4e8] sm:$0xff]  ;;  %v2667_v53 = vld [vmem:[%s4748_s4 + $0x278] sm:$0xff] }
 0x193   : > { %v1088_v59 = vsel %vm436_vm0, %v1086_v58, %v1087_v51  ;;  %1162 = vmatprep.subr.mxu1 %v1109_v57  ;;  %2673 = vmatpush2.msk.msra.mxu0 %vm1311_vm8, %v2670_v33  ;;  %v2668_v51 = vld [vmem:[%s4748_s4 + $0x280] sm:$0xff]  ;;  %v2666_v55 = vld [vmem:[%s4748_s4 + $0x270] sm:$0xff]  ;;  %v2665_v34 = vld [vmem:[%s4748_s4 + $0x268] sm:$0xff] }
 0x194   : > { %v1108_v60 = vmax.f32 %v1070_v36, %v1088_v59  ;;  %1374 = vmatprep.subr.mxu0 %v2669_v48  ;;  %v2664_v41 = vld [vmem:[%s4748_s4 + $0x260] sm:$0xff]  ;;  %v2663_v35 = vld [vmem:[%s4748_s4 + $0x258] sm:$0xff]  ;;  %v2662_v36 = vld [vmem:[%s4748_s4 + $0x250] sm:$0xff] }
 0x195   : > { %1375 = vmatpush2.msra.mxu0 %v2668_v51  ;;  %v2711_v56 = vld [vmem:[%s4748_s4 + $0x398] sm:$0xff]  ;;  %v2756_v59 = vld [vmem:[%s4748_s4 + $0x4e0] sm:$0xff]  ;;  %v2738_v48 = vld [vmem:[%s4748_s4 + $0x450] sm:$0xff] }
 0x196   : > { %1163 = vmatpush1.msra.mxu1 %v1108_v60  ;;  %1376 = vmatprep.subr.mxu0 %v2667_v53  ;;  %v2755_v60 = vld [vmem:[%s4748_s4 + $0x4d8] sm:$0xff]  ;;  %v2740_v30 = vld [vmem:[%s4748_s4 + $0x460] sm:$0xff]  ;;  %v2737_v51 = vld [vmem:[%s4748_s4 + $0x448] sm:$0xff] }
 0x197   : > { %2628 = vmatmul.mubr.msk.f32.vlgmr.msra.gmra.mxu1 %vm1118_vm7, %v1116_v61  ;;  %1405 = vmatprep.subr.mxu1 %v1240_v39  ;;  %v2754_v39 = vld [vmem:[%s4748_s4 + $0x4d0] sm:$0xff]  ;;  %v2739_v33 = vld [vmem:[%s4748_s4 + $0x458] sm:$0xff]  ;;  %v2736_v53 = vld [vmem:[%s4748_s4 + $0x440] sm:$0xff] }
 0x198   : > { %1202 = vmatprep.mubr.f32.mxu1 %v3109_v18  ;;  %1406 = vmatpush1.msra.mxu1 %v1239_v42 }
 0x199   : > { %1407 = vmatprep.subr.mxu1 %v1238_v62  ;;  %1377 = vmatpush2.msra.mxu0 %v2666_v55  ;;  %v2753_v62 = vld [vmem:[%s4748_s4 + $0x4c8] sm:$0xff]  ;;  %v2696_v55 = vld [vmem:[%s4748_s4 + $0x320] sm:$0xff] }
 0x19a   : > { %1408 = vmatpush1.msra.mxu1 %v1237_v63  ;;  %1378 = vmatprep.subr.mxu0 %v2665_v34  ;;  %v2735_v34 = vld [vmem:[%s4748_s4 + $0x438] sm:$0xff] }
 0x19b   : > { %2629 = vmatmul.mubr.msk.f32.gmra.mxu1 %vm1118_vm7, %v1117_v0  ;;  %1409 = vmatprep.subr.mxu1 %v1236_v1  ;;  %v2752_v1 = vld [vmem:[%s4748_s4 + $0x4c0] sm:$0xff] }
 0x19c   : > { %1410 = vmatpush1.msra.mxu1 %v1235_v2  ;;  %1379 = vmatpush2.msra.mxu0 %v2664_v41  ;;  %v2695_v41 = vld [vmem:[%s4748_s4 + $0x318] sm:$0xff] }
 0x19d   : > { %1411 = vmatprep.subr.mxu1 %v1234_v3  ;;  %1380 = vmatprep.subr.mxu0 %v2663_v35  ;;  %v2734_v35 = vld [vmem:[%s4748_s4 + $0x430] sm:$0xff] }
 0x19e   : > { %1412 = vmatpush1.msra.mxu1 %v1233_v4  ;;  %1381 = vmatpush2.msra.mxu0 %v2662_v36  ;;  %v2751_v4 = vld [vmem:[%s4748_s4 + $0x4b8] sm:$0xff]  ;;  %v2694_v36 = vld [vmem:[%s4748_s4 + $0x310] sm:$0xff] }
 0x19f   : > { %1413 = vmatprep.subr.mxu1 %v1232_v5  ;;  %1543 = vmatprep.subr.mxu0 %v2711_v56  ;;  %v2733_v56 = vld [vmem:[%s4748_s4 + $0x428] sm:$0xff] }
 0x1a0   : > { %1414 = vmatpush1.msra.mxu1 %v1231_v6 }
 0x1a1   : > { %1415 = vmatprep.subr.mxu1 %v1230_v7 }
 0x1a2   : > { %1416 = vmatpush1.msra.mxu1 %v1229_v8  ;;  %v2750_v8 = vld [vmem:[%s4748_s4 + $0x4b0] sm:$0xff] }
 0x1a3   : > { %1417 = vmatprep.subr.mxu1 %v1228_v10 }
 0x1a4   : > { %1418 = vmatpush1.msra.mxu1 %v1227_v11 }
 0x1a5   : > { %1419 = vmatprep.subr.mxu1 %v1226_v12 }
 0x1a6   : > { %1420 = vmatpush1.msra.mxu1 %v1225_v14 }
 0x1a7   : > { %1421 = vmatprep.subr.mxu1 %v1224_v15  ;;  %v2749_v15 = vld [vmem:[%s4748_s4 + $0x4a8] sm:$0xff] }
 0x1a8   : > { %1422 = vmatpush1.msra.mxu1 %v1223_v16  ;;  %v2710_v16 = vld [vmem:[%s4748_s4 + $0x390] sm:$0xff] }
 0x1a9   : > { %1423 = vmatprep.subr.mxu1 %v1222_v20  ;;  %v2748_v20 = vld [vmem:[%s4748_s4 + $0x4a0] sm:$0xff] }
 0x1aa   : > { %1424 = vmatpush1.msra.mxu1 %v1221_v24 }
 0x1ab   : > { %1425 = vmatprep.subr.mxu1 %v1220_v9  ;;  %v2709_v9 = vld [vmem:[%s4748_s4 + $0x388] sm:$0xff] }
 0x1ac   : > { %1426 = vmatpush1.msra.mxu1 %v1219_v21  ;;  %v2708_v21 = vld [vmem:[%s4748_s4 + $0x380] sm:$0xff] }
 0x1ad   : > { %1427 = vmatprep.subr.mxu1 %v1218_v23  ;;  %v2747_v23 = vld [vmem:[%s4748_s4 + $0x498] sm:$0xff] }
 0x1ae   : > { %1428 = vmatpush1.msra.mxu1 %v1217_v25  ;;  %v2707_v25 = vld [vmem:[%s4748_s4 + $0x378] sm:$0xff] }
 0x1af   : > { %1429 = vmatprep.subr.mxu1 %v1216_v27  ;;  %v2746_v27 = vld [vmem:[%s4748_s4 + $0x490] sm:$0xff] }
 0x1b0   : > { %1430 = vmatpush1.msra.mxu1 %v1215_v28 }
 0x1b1   : > { %1431 = vmatprep.subr.mxu1 %v1214_v29  ;;  %v2745_v29 = vld [vmem:[%s4748_s4 + $0x488] sm:$0xff] }
 0x1b2   : > { %1432 = vmatpush1.msra.mxu1 %v1213_v19  ;;  %v2706_v19 = vld [vmem:[%s4748_s4 + $0x370] sm:$0xff] }
 0x1b3   : > { %1433 = vmatprep.subr.mxu1 %v1212_v43 }
 0x1b4   : > { %1434 = vmatpush1.msra.mxu1 %v1211_v44  ;;  %v2705_v44 = vld [vmem:[%s4748_s4 + $0x368] sm:$0xff] }
 0x1b5   : > { %1435 = vmatprep.subr.mxu1 %v1210_v22  ;;  %v2744_v22 = vld [vmem:[%s4748_s4 + $0x480] sm:$0xff] }
 0x1b6   : > { %1436 = vmatpush1.msra.mxu1 %v1209_v31 }
 0x1b7   : > { %2676 = vmatprep.subr.msk.mxu1 %vm1311_vm8, %v1250_v45  ;;  %v2704_v45 = vld [vmem:[%s4748_s4 + $0x360] sm:$0xff] }
 0x1b8   : > { %2677 = vmatpush2.msk.msra.mxu1 %vm1311_vm8, %v1249_v46  ;;  %v2743_v46 = vld [vmem:[%s4748_s4 + $0x478] sm:$0xff] }
 0x1b9   : > { %1461 = vmatprep.subr.mxu1 %v1248_v13  ;;  %v2703_v13 = vld [vmem:[%s4748_s4 + $0x358] sm:$0xff] }
 0x1ba   : > { %1462 = vmatpush2.msra.mxu1 %v1247_v17  ;;  %v2742_v17 = vld [vmem:[%s4748_s4 + $0x470] sm:$0xff] }
 0x1bb   : > { %1463 = vmatprep.subr.mxu1 %v1246_v47  ;;  %v2702_v47 = vld [vmem:[%s4748_s4 + $0x350] sm:$0xff] }
 0x1bc   : > { %1464 = vmatpush2.msra.mxu1 %v1245_v32  ;;  %v2741_v32 = vld [vmem:[%s4748_s4 + $0x468] sm:$0xff] }
 0x1bd   : > { %1465 = vmatprep.subr.mxu1 %v1244_v38  ;;  %v2701_v38 = vld [vmem:[%s4748_s4 + $0x348] sm:$0xff] }
 0x1be   : > { %1466 = vmatpush2.msra.mxu1 %v1243_v26  ;;  %v2700_v26 = vld [vmem:[%s4748_s4 + $0x340] sm:$0xff] }
 0x1bf   : > { %1467 = vmatprep.subr.mxu1 %v1242_v37  ;;  %v2699_v37 = vld [vmem:[%s4748_s4 + $0x338] sm:$0xff] }
 0x1c0   : > { %1468 = vmatpush2.msra.mxu1 %v1241_v50  ;;  %v2698_v50 = vld [vmem:[%s4748_s4 + $0x330] sm:$0xff] }
 0x1c1   : > { %1685 = vmatprep.subr.mxu1 %v2757_v52  ;;  %v2697_v52 = vld [vmem:[%s4748_s4 + $0x328] sm:$0xff] }
 0x257   : > { %v3791_v57 = vpop.f32.mrf.mxu1 }
 0x258   : > { %v1809_v63 = vrot.slane %v3791_v57, 4  ;;  %v1298_v11 = vrot.slane %v3791_v57, 1 }
 0x259   : > { %v3793_v58 = vpop.f32.mrf.mxu1 }
 0x25a   : > { %2678 = vmatprep.mubr.msk.f32.mxu1 %vm1306_vm9, %v3793_v58  ;;  %v1301_v2 = vrot.slane %v3793_v58, 1  ;;  %v1670_v6 = vrot.slane %v3793_v58, 3  ;;  %v1528_v43 = vrot.slane %v3793_v58, 2 }
 0x25b   : > { %v3803_v61 = vpop.f32.mrf.mxu1  ;;  %1470 = vmatmul.mubr.f32.vlgmr.msra.gmra.mxu1 %v3791_v57 }
 0x25c   : > { %v1810_v42 = vrot.slane %v3803_v61, 4  ;;  %1686 = vmatpush1.msra.mxu1 %v2756_v59  ;;  %v1299_v3 = vrot.slane %v3803_v61, 1  ;;  %v2693_v59 = vld [vmem:[%s4748_s4 + $0x308] sm:$0xff] }
 0x25d   : > { %1687 = vmatprep.subr.mxu1 %v2755_v60  ;;  %v3814_v0 = vpop.f32.mrf.mxu1  ;;  %v2732_v60 = vld [vmem:[%s4748_s4 + $0x420] sm:$0xff] }
 0x25e   : > { %1688 = vmatpush1.msra.mxu1 %v2754_v39  ;;  %2679 = vmatprep.mubr.msk.f32.mxu1 %vm1306_vm9, %v3814_v0  ;;  %v1302_v5 = vrot.slane %v3814_v0, 1  ;;  %v1671_v7 = vrot.slane %v3814_v0, 3  ;;  %v3836_v10 = vsel %vm892_vm4, %v1809_v63, %v1810_v42  ;;  %v1300_v24 = vsel %vm436_vm0, %v1298_v11, %v1299_v3  ;;  %v2692_v39 = vld [vmem:[%s4748_s4 + $0x300] sm:$0xff]  ;;  %v2691_v63 = vld [vmem:[%s4748_s4 + $0x2f8] sm:$0xff] }
 0x25f   : > { %1689 = vmatprep.subr.mxu1 %v2753_v62  ;;  %1476 = vmatmul.mubr.f32.gmra.mxu1 %v3803_v61  ;;  %v1529_v28 = vrot.slane %v3814_v0, 2  ;;  %v2731_v62 = vld [vmem:[%s4748_s4 + $0x418] sm:$0xff] }
 0x260   : > { %1690 = vmatpush1.msra.mxu1 %v2752_v1  ;;  %v1303_v12 = vsel %vm436_vm0, %v1301_v2, %v1302_v5  ;;  %v1672_v14 = vsel %vm770_vm3, %v1670_v6, %v1671_v7  ;;  %v2730_v1 = vld [vmem:[%s4748_s4 + $0x410] sm:$0xff]  ;;  %v2688_v6 = vld [vmem:[%s4748_s4 + $0x2e0] sm:$0xff]  ;;  %v2687_v11 = vld [vmem:[%s4748_s4 + $0x2d8] sm:$0xff] }
 0x261   : > { %1691 = vmatprep.subr.mxu1 %v2751_v4  ;;  %2674 = vmatprep.mubr.msk.f32.mxu0 %vm1306_vm9, %v1303_v12  ;;  %v1530_v31 = vsel %vm648_vm2, %v1528_v43, %v1529_v28  ;;  %v2690_v2 = vld [vmem:[%s4748_s4 + $0x2f0] sm:$0xff]  ;;  %v2689_v4 = vld [vmem:[%s4748_s4 + $0x2e8] sm:$0xff]  ;;  %v2680_v43 = vld [vmem:[%s4748_s4 + $0x2a0] sm:$0xff] }
 0x262   : > { %1692 = vmatpush1.msra.mxu1 %v2750_v8  ;;  %2770 = vmatprep.mubr.msk.f32.mxu1 %vm1306_vm9, %v1672_v14  ;;  %v2727_v8 = vld [vmem:[%s4748_s4 + $0x3f8] sm:$0xff]  ;;  %v2726_v12 = vld [vmem:[%s4748_s4 + $0x3f0] sm:$0xff] }
 0x263   : > { %1383 = vmatmul.mubr.f32.vlgmr.msra.gmra.mxu0 %v1300_v24  ;;  %1693 = vmatprep.subr.mxu1 %v2749_v15  ;;  %v2686_v14 = vld [vmem:[%s4748_s4 + $0x2d0] sm:$0xff]  ;;  %v2767_v15 = vld [vmem:[%s4748_s4 + $0x538] sm:$0x3]  ;;  %v2684_v24 = vld [vmem:[%s4748_s4 + $0x2c0] sm:$0xff] }
 0x264   : > { %1544 = vmatpush1.msra.mxu0 %v2710_v16  ;;  %1694 = vmatpush1.msra.mxu1 %v2748_v20  ;;  %v2685_v16 = vld [vmem:[%s4748_s4 + $0x2c8] sm:$0xff]  ;;  %v2766_v20 = vld [vmem:[%s4748_s4 + $0x530] sm:$0x3] }
 0x265   : > { %1545 = vmatprep.subr.mxu0 %v2709_v9  ;;  %2675 = vmatprep.mubr.msk.f32.mxu0 %vm1306_vm9, %v1302_v5  ;;  %v2728_v5 = vld [vmem:[%s4748_s4 + $0x400] sm:$0xff]  ;;  %v2765_v9 = vld [vmem:[%s4748_s4 + $0x528] sm:$0xff] }
 0x266   : > { %1546 = vmatpush1.msra.mxu0 %v2708_v21  ;;  %1695 = vmatprep.subr.mxu1 %v2747_v23  ;;  %v2683_v21 = vld [vmem:[%s4748_s4 + $0x2b8] sm:$0xff]  ;;  %v2764_v23 = vld [vmem:[%s4748_s4 + $0x520] sm:$0xff] }
 0x267   : > { %1547 = vmatprep.subr.mxu0 %v2707_v25  ;;  %1696 = vmatpush1.msra.mxu1 %v2746_v27  ;;  %v2682_v25 = vld [vmem:[%s4748_s4 + $0x2b0] sm:$0xff]  ;;  %v2763_v27 = vld [vmem:[%s4748_s4 + $0x518] sm:$0xff] }
 0x268   : > { %1389 = vmatmul.mubr.f32.gmra.mxu0 %v1299_v3  ;;  %1697 = vmatprep.subr.mxu1 %v2745_v29  ;;  %v2729_v3 = vld [vmem:[%s4748_s4 + $0x408] sm:$0xff] }
 0x269   : > { %1548 = vmatpush1.msra.mxu0 %v2706_v19  ;;  %2724 = vmatprep.mubr.msk.f32.mxu0 %vm1306_vm9, %v1530_v31  ;;  %v2681_v29 = vld [vmem:[%s4748_s4 + $0x2a8] sm:$0xff]  ;;  %v2762_v19 = vld [vmem:[%s4748_s4 + $0x510] sm:$0xff]  ;;  %v2760_v31 = vld [vmem:[%s4748_s4 + $0x500] sm:$0xff] }
 0x26a   : > { %1549 = vmatprep.subr.mxu0 %v2705_v44  ;;  %1698 = vmatpush1.msra.mxu1 %v2744_v22  ;;  %v2761_v44 = vld [vmem:[%s4748_s4 + $0x508] sm:$0xff] }
 0x26b   : > { %1550 = vmatpush1.msra.mxu0 %v2704_v45  ;;  %1699 = vmatprep.subr.mxu1 %v2743_v46  ;;  %v2721_v22 = vld [vmem:[%s4748_s4 + $0x3e8] sm:$0x3]  ;;  %v1668_v45 = vrot.slane %v3803_v61, 3  ;;  %v2720_v46 = vld [vmem:[%s4748_s4 + $0x3e0] sm:$0x3] }
 0x26c   : > { %1551 = vmatprep.subr.mxu0 %v2703_v13  ;;  %1700 = vmatpush1.msra.mxu1 %v2742_v17  ;;  %v2759_v13 = vld [vmem:[%s4748_s4 + $0x4f8] sm:$0xff] }
 0x26d   : > { %1552 = vmatpush1.msra.mxu0 %v2702_v47  ;;  %1701 = vmatprep.subr.mxu1 %v2741_v32  ;;  %v2719_v17 = vld [vmem:[%s4748_s4 + $0x3d8] sm:$0xff]  ;;  %v2758_v47 = vld [vmem:[%s4748_s4 + $0x4f0] sm:$0xff]  ;;  %v1667_v32 = vrot.slane %v3791_v57, 3 }
 0x26e   : > { %1553 = vmatprep.subr.mxu0 %v2701_v38  ;;  %1702 = vmatpush1.msra.mxu1 %v2740_v30  ;;  %v2718_v38 = vld [vmem:[%s4748_s4 + $0x3d0] sm:$0xff]  ;;  %v2717_v30 = vld [vmem:[%s4748_s4 + $0x3c8] sm:$0xff] }
 0x26f   : > { %1554 = vmatpush1.msra.mxu0 %v2700_v26  ;;  %1703 = vmatprep.subr.mxu1 %v2739_v33  ;;  %v1669_v26 = vsel %vm770_vm3, %v1667_v32, %v1668_v45  ;;  %v2716_v33 = vld [vmem:[%s4748_s4 + $0x3c0] sm:$0xff] }
 0x270   : > { %1555 = vmatprep.subr.mxu0 %v2699_v37  ;;  %1704 = vmatpush1.msra.mxu1 %v2738_v48  ;;  %v2715_v37 = vld [vmem:[%s4748_s4 + $0x3b8] sm:$0xff]  ;;  %v2714_v48 = vld [vmem:[%s4748_s4 + $0x3b0] sm:$0xff]  ;;  %v2804_v32 = vld [vmem:[%s4748_s4 + $0x640] sm:$0xff] }
 0x271   : > { %1556 = vmatpush1.msra.mxu0 %v2698_v50  ;;  %1705 = vmatprep.subr.mxu1 %v2737_v51  ;;  %v1526_v50 = vrot.slane %v3803_v61, 2  ;;  %v2713_v51 = vld [vmem:[%s4748_s4 + $0x3a8] sm:$0xff]  ;;  %v1908_v61 = vld [vmem:[%s4749_s5] sm:$0x3] }
 0x272   : > { %1557 = vmatprep.subr.mxu0 %v2697_v52  ;;  %1706 = vmatpush1.msra.mxu1 %v2736_v53  ;;  %v2712_v52 = vld [vmem:[%s4748_s4 + $0x3a0] sm:$0xff]  ;;  %v1525_v53 = vrot.slane %v3791_v57, 2 }
 0x273   : > { %1558 = vmatpush1.msra.mxu0 %v2696_v55  ;;  %1707 = vmatprep.subr.mxu1 %v2735_v34  ;;  %v2802_v55 = vld [vmem:[%s4748_s4 + $0x630] sm:$0xff]  ;;  %v2800_v57 = vld [vmem:[%s4748_s4 + $0x620] sm:$0xff] }
 0x274   : > { %1559 = vmatprep.subr.mxu0 %v2695_v41  ;;  %1708 = vmatpush1.msra.mxu1 %v2734_v35  ;;  %v1527_v34 = vsel %vm648_vm2, %v1525_v53, %v1526_v50  ;;  %v2801_v41 = vld [vmem:[%s4748_s4 + $0x628] sm:$0xff]  ;;  %v1813_v35 = vrot.slane %v3814_v0, 4  ;;  %vm2498_vm2 = vcmask 73728  }
 0x275   : > { %1560 = vmatpush1.msra.mxu0 %v2694_v36  ;;  %1709 = vmatprep.subr.mxu1 %v2733_v56  ;;  %v2799_v36 = vld [vmem:[%s4748_s4 + $0x618] sm:$0xff]  ;;  %v2798_v56 = vld [vmem:[%s4748_s4 + $0x610] sm:$0xff] }
 0x276   : > { %1561 = vmatprep.subr.mxu0 %v2693_v59  ;;  %1710 = vmatpush1.msra.mxu1 %v2732_v60  ;;  %v1812_v59 = vrot.slane %v3793_v58, 4  ;;  %v2797_v60 = vld [vmem:[%s4748_s4 + $0x608] sm:$0xff]  ;;  %v2795_v58 = vld [vmem:[%s4748_s4 + $0x5f8] sm:$0xff] }
 0x277   : > { %1562 = vmatpush1.msra.mxu0 %v2692_v39  ;;  %1711 = vmatprep.subr.mxu1 %v2731_v62  ;;  %v2796_v39 = vld [vmem:[%s4748_s4 + $0x600] sm:$0xff]  ;;  %v2794_v62 = vld [vmem:[%s4748_s4 + $0x5f0] sm:$0xff] }
 0x278   : > { %1563 = vmatprep.subr.mxu0 %v2691_v63  ;;  %1712 = vmatpush1.msra.mxu1 %v2730_v1  ;;  %v2793_v63 = vld [vmem:[%s4748_s4 + $0x5e8] sm:$0xff]  ;;  %v2792_v1 = vld [vmem:[%s4748_s4 + $0x5e0] sm:$0xff] }
 0x279   : > { %1564 = vmatpush1.msra.mxu0 %v2690_v2  ;;  %1713 = vmatprep.subr.mxu1 %v2729_v3  ;;  %v2791_v2 = vld [vmem:[%s4748_s4 + $0x5d8] sm:$0xff]  ;;  %v2790_v3 = vld [vmem:[%s4748_s4 + $0x5d0] sm:$0xff] }
 0x27a   : > { %1565 = vmatprep.subr.mxu0 %v2689_v4  ;;  %1714 = vmatpush1.msra.mxu1 %v2728_v5  ;;  %v2789_v4 = vld [vmem:[%s4748_s4 + $0x5c8] sm:$0xff]  ;;  %v2788_v5 = vld [vmem:[%s4748_s4 + $0x5c0] sm:$0xff] }
 0x27b   : > { %1566 = vmatpush1.msra.mxu0 %v2688_v6  ;;  %1715 = vmatprep.subr.mxu1 %v2727_v8  ;;  %v2787_v6 = vld [vmem:[%s4748_s4 + $0x5b8] sm:$0xff]  ;;  %v2786_v8 = vld [vmem:[%s4748_s4 + $0x5b0] sm:$0xff] }
 0x27c   : > { %1567 = vmatprep.subr.mxu0 %v2687_v11  ;;  %1716 = vmatpush1.msra.mxu1 %v2726_v12  ;;  %v2785_v11 = vld [vmem:[%s4748_s4 + $0x5a8] sm:$0xff]  ;;  %v2784_v12 = vld [vmem:[%s4748_s4 + $0x5a0] sm:$0xff] }
 0x27d   : > { %1568 = vmatpush1.msra.mxu0 %v2686_v14  ;;  %2768 = vmatprep.subr.msk.mxu1 %vm1311_vm8, %v2767_v15  ;;  %v2783_v14 = vld [vmem:[%s4748_s4 + $0x598] sm:$0xff]  ;;  %v2782_v15 = vld [vmem:[%s4748_s4 + $0x590] sm:$0xff] }
 0x27e   : > { %1569 = vmatprep.subr.mxu0 %v2685_v16  ;;  %2769 = vmatpush2.msk.msra.mxu1 %vm1311_vm8, %v2766_v20  ;;  %v2781_v16 = vld [vmem:[%s4748_s4 + $0x588] sm:$0xff]  ;;  %v2780_v20 = vld [vmem:[%s4748_s4 + $0x580] sm:$0xff] }
 0x27f   : > { %1570 = vmatpush1.msra.mxu0 %v2684_v24  ;;  %1741 = vmatprep.subr.mxu1 %v2765_v9  ;;  %v2779_v24 = vld [vmem:[%s4748_s4 + $0x578] sm:$0xff]  ;;  %v2778_v9 = vld [vmem:[%s4748_s4 + $0x570] sm:$0xff] }
 0x280   : > { %1571 = vmatprep.subr.mxu0 %v2683_v21  ;;  %1742 = vmatpush2.msra.mxu1 %v2764_v23  ;;  %v2777_v21 = vld [vmem:[%s4748_s4 + $0x568] sm:$0xff]  ;;  %v2776_v23 = vld [vmem:[%s4748_s4 + $0x560] sm:$0xff] }
 0x281   : > { %1572 = vmatpush1.msra.mxu0 %v2682_v25  ;;  %1743 = vmatprep.subr.mxu1 %v2763_v27  ;;  %v2775_v25 = vld [vmem:[%s4748_s4 + $0x558] sm:$0xff]  ;;  %v2774_v27 = vld [vmem:[%s4748_s4 + $0x550] sm:$0xff] }
 0x282   : > { %1573 = vmatprep.subr.mxu0 %v2681_v29  ;;  %1744 = vmatpush2.msra.mxu1 %v2762_v19  ;;  %v2773_v29 = vld [vmem:[%s4748_s4 + $0x548] sm:$0xff]  ;;  %v2772_v19 = vld [vmem:[%s4748_s4 + $0x540] sm:$0xff] }
 0x283   : > { %1574 = vmatpush1.msra.mxu0 %v2680_v43  ;;  %1745 = vmatprep.subr.mxu1 %v2761_v44  ;;  %v2813_v43 = vld [vmem:[%s4748_s4 + $0x688] sm:$0x3]  ;;  %v2812_v44 = vld [vmem:[%s4748_s4 + $0x680] sm:$0x3] }
 0x284   : > { %2722 = vmatprep.subr.msk.mxu0 %vm1311_vm8, %v2721_v22  ;;  %1746 = vmatpush2.msra.mxu1 %v2760_v31  ;;  %v2811_v22 = vld [vmem:[%s4748_s4 + $0x678] sm:$0xff]  ;;  %v2810_v31 = vld [vmem:[%s4748_s4 + $0x670] sm:$0xff] }
 0x285   : > { %2723 = vmatpush2.msk.msra.mxu0 %vm1311_vm8, %v2720_v46  ;;  %1747 = vmatprep.subr.mxu1 %v2759_v13  ;;  %v2808_v46 = vld [vmem:[%s4748_s4 + $0x660] sm:$0xff]  ;;  %v2807_v13 = vld [vmem:[%s4748_s4 + $0x658] sm:$0xff] }
 0x286   : > { %1599 = vmatprep.subr.mxu0 %v2719_v17  ;;  %1748 = vmatpush2.msra.mxu1 %v2758_v47  ;;  %v2806_v17 = vld [vmem:[%s4748_s4 + $0x650] sm:$0xff]  ;;  %v2805_v47 = vld [vmem:[%s4748_s4 + $0x648] sm:$0xff] }
 0x287   : > { %1600 = vmatpush2.msra.mxu0 %v2718_v38  ;;  %1750 = vmatmul.mubr.f32.vlgmr.msra.gmra.mxu1 %v1669_v26 }
 0x288   : > { %1601 = vmatprep.subr.mxu0 %v2717_v30  ;;  %2771 = vmatprep.mubr.msk.f32.mxu1 %vm1306_vm9, %v1671_v7  ;;  %v2803_v7 = vld [vmem:[%s4748_s4 + $0x638] sm:$0xff] }
 0x289   : > { %1602 = vmatpush2.msra.mxu0 %v2716_v33 }
 0x28a   : > { %1603 = vmatprep.subr.mxu0 %v2715_v37 }
 0x28b   : > { %1604 = vmatpush2.msra.mxu0 %v2714_v48  ;;  %1756 = vmatmul.mubr.f32.gmra.mxu1 %v1668_v45  ;;  %v2809_v45 = vld [vmem:[%s4748_s4 + $0x668] sm:$0xff] }
 0x28c   : > { %1605 = vmatprep.subr.mxu0 %v2713_v51 }
 0x28d   : > { %1606 = vmatpush2.msra.mxu0 %v2712_v52 }
 0x28e   : > { %1608 = vmatmul.mubr.f32.vlgmr.msra.gmra.mxu0 %v1527_v34  ;;  %1827 = vmatprep.subr.mxu0 %v2803_v7 }
 0x28f   : > { %2725 = vmatprep.mubr.msk.f32.mxu0 %vm1306_vm9, %v1529_v28  ;;  %1828 = vmatpush1.msra.mxu0 %v2802_v55  ;;  %v1814_v28 = vsel %vm892_vm4, %v1812_v59, %v1813_v35 }
 0x290   : > { %1829 = vmatprep.subr.mxu0 %v2801_v41 }
 0x291   : > { %1830 = vmatpush1.msra.mxu0 %v2800_v57 }
 0x292   : > { %1614 = vmatmul.mubr.f32.gmra.mxu0 %v1526_v50  ;;  %1831 = vmatprep.subr.mxu0 %v2799_v36 }
 0x293   : > { %1832 = vmatpush1.msra.mxu0 %v2798_v56  ;;  %2816 = vmatprep.mubr.msk.f32.mxu0 %vm1306_vm9, %v1814_v28 }
 0x294   : > { %1833 = vmatprep.subr.mxu0 %v2797_v60  ;;  %v1913_v60 = vrot.slane %v1908_v61, %v1009_v49 }
 0x295   : > { %1834 = vmatpush1.msra.mxu0 %v2796_v39 }
 0x296   : > { %1835 = vmatprep.subr.mxu0 %v2795_v58 }
 0x297   : > { %1836 = vmatpush1.msra.mxu0 %v2794_v62 }
 0x298   : > { %1837 = vmatprep.subr.mxu0 %v2793_v63 }
 0x299   : > { %1838 = vmatpush1.msra.mxu0 %v2792_v1  ;;  %v1917_v1 = vrot.slane %v1908_v61, %v1013_v54  ;;  %v2034_v61 = vld [vmem:[%s4750_s6 + $0xa8] sm:$0xff] }
 0x29a   : > { %1839 = vmatprep.subr.mxu0 %v2791_v2 }
 0x29b   : > { %1840 = vmatpush1.msra.mxu0 %v2790_v3 }
 0x29c   : > { %1841 = vmatprep.subr.mxu0 %v2789_v4 }
 0x29d   : > { %1842 = vmatpush1.msra.mxu0 %v2788_v5 }
 0x29e   : > { %1843 = vmatprep.subr.mxu0 %v2787_v6 }
 0x29f   : > { %1844 = vmatpush1.msra.mxu0 %v2786_v8 }
 0x2a0   : > { %1845 = vmatprep.subr.mxu0 %v2785_v11 }
 0x2a1   : > { %1846 = vmatpush1.msra.mxu0 %v2784_v12 }
 0x2a2   : > { %1847 = vmatprep.subr.mxu0 %v2783_v14 }
 0x2a3   : > { %1848 = vmatpush1.msra.mxu0 %v2782_v15 }
 0x2a4   : > { %1849 = vmatprep.subr.mxu0 %v2781_v16 }
 0x2a5   : > { %1850 = vmatpush1.msra.mxu0 %v2780_v20 }
 0x2a6   : > { %1851 = vmatprep.subr.mxu0 %v2779_v24 }
 0x2a7   : > { %1852 = vmatpush1.msra.mxu0 %v2778_v9 }
 0x2a8   : > { %1853 = vmatprep.subr.mxu0 %v2777_v21 }
 0x2a9   : > { %1854 = vmatpush1.msra.mxu0 %v2776_v23  ;;  %v2092_v23 = vld [vmem:[%s4750_s6 + $0x278] sm:$0xff] }
 0x2aa   : > { %1855 = vmatprep.subr.mxu0 %v2775_v25  ;;  %v2091_v25 = vld [vmem:[%s4750_s6 + $0x270] sm:$0xff] }
 0x2ab   : > { %1856 = vmatpush1.msra.mxu0 %v2774_v27  ;;  %v2044_v27 = vld [vmem:[%s4750_s6 + $0xf8] sm:$0xff] }
 0x2ac   : > { %1857 = vmatprep.subr.mxu0 %v2773_v29  ;;  %v2028_v29 = vld [vmem:[%s4750_s6 + $0x78] sm:$0xff]  ;;  %2826 = vmatprep.subr.mxu1 %v2044_v27 }
 0x2ad   : > { %1858 = vmatpush1.msra.mxu0 %v2772_v19  ;;  %v2090_v19 = vld [vmem:[%s4750_s6 + $0x268] sm:$0xff]  ;;  %2827 = vmatpush3.msra.mxu1 %v2028_v29 }
 0x2ae   : > { %2814 = vmatprep.subr.msk.mxu0 %vm1311_vm8, %v2813_v43  ;;  %v2043_v43 = vld [vmem:[%s4750_s6 + $0xf0] sm:$0xff] }
 0x2af   : > { %2815 = vmatpush2.msk.msra.mxu0 %vm1311_vm8, %v2812_v44  ;;  %v2027_v44 = vld [vmem:[%s4750_s6 + $0x70] sm:$0xff]  ;;  %2828 = vmatprep.subr.mxu1 %v2043_v43 }
 0x2b0   : > { %1883 = vmatprep.subr.mxu0 %v2811_v22  ;;  %v2042_v22 = vld [vmem:[%s4750_s6 + $0xe8] sm:$0xff]  ;;  %2829 = vmatpush3.msra.mxu1 %v2027_v44 }
 0x2b1   : > { %1884 = vmatpush2.msra.mxu0 %v2810_v31  ;;  %v2089_v31 = vld [vmem:[%s4750_s6 + $0x260] sm:$0xff]  ;;  %2830 = vmatprep.subr.mxu1 %v2042_v22 }
 0x2b2   : > { %1885 = vmatprep.subr.mxu0 %v2809_v45  ;;  %v2026_v45 = vld [vmem:[%s4750_s6 + $0x68] sm:$0xff] }
 0x2b3   : > { %1886 = vmatpush2.msra.mxu0 %v2808_v46  ;;  %v2041_v46 = vld [vmem:[%s4750_s6 + $0xe0] sm:$0xff]  ;;  %2831 = vmatpush3.msra.mxu1 %v2026_v45 }
 0x2b4   : > { %1887 = vmatprep.subr.mxu0 %v2807_v13  ;;  %v2088_v13 = vld [vmem:[%s4750_s6 + $0x258] sm:$0xff]  ;;  %2832 = vmatprep.subr.mxu1 %v2041_v46 }
 0x2b5   : > { %1888 = vmatpush2.msra.mxu0 %v2806_v17  ;;  %v2025_v17 = vld [vmem:[%s4750_s6 + $0x60] sm:$0xff] }
 0x2b6   : > { %1889 = vmatprep.subr.mxu0 %v2805_v47  ;;  %v2040_v47 = vld [vmem:[%s4750_s6 + $0xd8] sm:$0xff]  ;;  %2833 = vmatpush3.msra.mxu1 %v2025_v17  ;;  %v2095_v17 = vld [vmem:[%s4750_s6 + $0x290] sm:$0xff] }
 0x2b7   : > { %1890 = vmatpush2.msra.mxu0 %v2804_v32  ;;  %v2087_v32 = vld [vmem:[%s4750_s6 + $0x250] sm:$0xff]  ;;  %2834 = vmatprep.subr.mxu1 %v2040_v47 }
 0x2b8   : > { %1892 = vmatmul.mubr.f32.vlgmr.msra.gmra.mxu0 %v3836_v10  ;;  %2247 = vmatprep.subr.mxu0 %v3109_v18 }
 0x2b9   : > { %2817 = vmatprep.mubr.msk.f32.mxu0 %vm1306_vm9, %v1813_v35  ;;  %2248 = vmatpush1.msra.mxu0 %v2092_v23  ;;  %v2099_v23 = vld [vmem:[%s4750_s6 + $0x2b0] sm:$0xff] }
 0x2ba   : > { %2249 = vmatprep.subr.mxu0 %v3109_v18 }
 0x2bb   : > { %2250 = vmatpush1.msra.mxu0 %v2091_v25 }
 0x2bc   : > { %1898 = vmatmul.mubr.f32.gmra.mxu0 %v1810_v42  ;;  %2251 = vmatprep.subr.mxu0 %v3109_v18 }
 0x2bd   : > { %2252 = vmatpush1.msra.mxu0 %v2090_v19 }
 0x2be   : > { %2253 = vmatprep.subr.mxu0 %v3109_v18 }
 0x2bf   : > { %2254 = vmatpush1.msra.mxu0 %v2089_v31  ;;  %v2098_v31 = vld [vmem:[%s4750_s6 + $0x2a8] sm:$0xff] }
 0x2c0   : > { %2255 = vmatprep.subr.mxu0 %v3109_v18 }
 0x2c1   : > { %2256 = vmatpush1.msra.mxu0 %v2088_v13 }
 0x2c2   : > { %2257 = vmatprep.subr.mxu0 %v3109_v18 }
 0x2c3   : > { %2258 = vmatpush1.msra.mxu0 %v2087_v32 }
 0x2c4   : > { %2259 = vmatprep.subr.mxu0 %v3109_v18 }
 0x31b   : > { %v1471_v26 = vpop.f32.mrf.mxu1 }
 0x31d   : > { %v1473_v37 = vpop.f32.mrf.mxu1 }
 0x31f   : > { %v1477_v50 = vpop.f32.mrf.mxu1 }
 0x321   : > { %v1479_v52 = vpop.f32.mrf.mxu1 }
 0x323   : > { %v1384_v38 = vpop.f32.mrf.mxu0 }
 0x324   : > { %v1472_v7 = vadd.f32 %v1471_v26, %v1384_v38  ;;  %v2024_v38 = vld [vmem:[%s4750_s6 + $0x58] sm:$0xff]  ;;  %v2086_v26 = vld [vmem:[%s4750_s6 + $0x248] sm:$0xff] }
 0x325   : > { %v1386_v30 = vpop.f32.mrf.mxu0  ;;  %2835 = vmatpush3.msra.mxu1 %v2024_v38  ;;  %2260 = vmatpush1.msra.mxu0 %v2086_v26 }
 0x326   : > { %v1474_v34 = vadd.f32 %v1473_v37, %v1386_v30  ;;  %v2039_v30 = vld [vmem:[%s4750_s6 + $0xd0] sm:$0xff]  ;;  %v2038_v37 = vld [vmem:[%s4750_s6 + $0xc8] sm:$0xff]  ;;  %2261 = vmatprep.subr.mxu0 %v3109_v18 }
 0x327   : > { %2836 = vmatprep.subr.mxu1 %v2039_v30  ;;  %v2094_v30 = vld [vmem:[%s4750_s6 + $0x288] sm:$0xff] }
 0x328   : > { %v1390_v33 = vpop.f32.mrf.mxu0 }
 0x329   : > { %v1478_v42 = vadd.f32 %v1477_v50, %v1390_v33  ;;  %v2023_v33 = vld [vmem:[%s4750_s6 + $0x50] sm:$0xff]  ;;  %v2022_v50 = vld [vmem:[%s4750_s6 + $0x48] sm:$0xff] }
 0x32a   : > { %v1392_v48 = vpop.f32.mrf.mxu0  ;;  %2837 = vmatpush3.msra.mxu1 %v2023_v33  ;;  %v2093_v33 = vld [vmem:[%s4750_s6 + $0x280] sm:$0xff] }
 0x32b   : > { %v1480_v36 = vadd.f32 %v1479_v52, %v1392_v48  ;;  %v2085_v48 = vld [vmem:[%s4750_s6 + $0x240] sm:$0xff]  ;;  %v2084_v52 = vld [vmem:[%s4750_s6 + $0x238] sm:$0xff]  ;;  %2838 = vmatprep.subr.mxu1 %v2038_v37 }
 0x32c   : > { %2262 = vmatpush1.msra.mxu0 %v2085_v48  ;;  %2839 = vmatpush3.msra.mxu1 %v2022_v50 }
 0x32d   : > { %2263 = vmatprep.subr.mxu0 %v3109_v18 }
 0x32e   : > { %2264 = vmatpush1.msra.mxu0 %v2084_v52 }
 0x32f   : > { %2265 = vmatprep.subr.mxu0 %v3109_v18 }
 0x347   : > { %v1751_v10 = vpop.f32.mrf.mxu1 }
 0x349   : > { %v1753_v41 = vpop.f32.mrf.mxu1 }
 0x34b   : > { %v1757_v28 = vpop.f32.mrf.mxu1 }
 0x34d   : > { %v1759_v6 = vpop.f32.mrf.mxu1 }
 0x34e   : > { %v1609_v51 = vpop.f32.mrf.mxu0 }
 0x34f   : > { %v1620_v0 = vadd.f32 %v1609_v51, %v1472_v7  ;;  %v2037_v51 = vld [vmem:[%s4750_s6 + $0xc0] sm:$0xff]  ;;  %v2083_v7 = vld [vmem:[%s4750_s6 + $0x230] sm:$0xff] }
 0x350   : > { %v1611_v53 = vpop.f32.mrf.mxu0  ;;  %2840 = vmatprep.subr.mxu1 %v2037_v51  ;;  %2266 = vmatpush1.msra.mxu0 %v2083_v7  ;;  %v2060_v7 = vld [vmem:[%s4750_s6 + $0x178] sm:$0xff] }
 0x351   : > { %v1621_v57 = vadd.f32 %v1611_v53, %v1474_v34  ;;  %v1762_v59 = vadd.f32 %v1751_v10, %v1620_v0  ;;  %v2021_v53 = vld [vmem:[%s4750_s6 + $0x40] sm:$0xff]  ;;  %v2036_v10 = vld [vmem:[%s4750_s6 + $0xb8] sm:$0xff]  ;;  %v2035_v34 = vld [vmem:[%s4750_s6 + $0xb0] sm:$0xff]  ;;  %2267 = vmatprep.subr.mxu0 %v3109_v18 }
 0x352   : > { %v1615_v55 = vpop.f32.mrf.mxu0  ;;  %2841 = vmatpush3.msra.mxu1 %v2021_v53  ;;  %v2082_v0 = vld [vmem:[%s4750_s6 + $0x228] sm:$0xff] }
 0x353   : > { %v1622_v56 = vadd.f32 %v1615_v55, %v1478_v42  ;;  %v1763_v63 = vadd.f32 %v1753_v41, %v1621_v57  ;;  %v2020_v55 = vld [vmem:[%s4750_s6 + $0x38] sm:$0xff]  ;;  %2842 = vmatprep.subr.mxu1 %v2036_v10  ;;  %v2019_v41 = vld [vmem:[%s4750_s6 + $0x30] sm:$0xff]  ;;  %v2081_v42 = vld [vmem:[%s4750_s6 + $0x220] sm:$0xff]  ;;  %2268 = vmatpush1.msra.mxu0 %v2082_v0 }
 0x354   : > { %v1617_v35 = vpop.f32.mrf.mxu0  ;;  %2843 = vmatpush3.msra.mxu1 %v2020_v55  ;;  %v2018_v57 = vld [vmem:[%s4750_s6 + $0x28] sm:$0xff]  ;;  %2269 = vmatprep.subr.mxu0 %v3109_v18 }
 0x355   : > { %v1623_v58 = vadd.f32 %v1617_v35, %v1480_v36  ;;  %v1764_v5 = vadd.f32 %v1757_v28, %v1622_v56  ;;  %2844 = vmatprep.subr.mxu1 %v2035_v34  ;;  %v2033_v35 = vld [vmem:[%s4750_s6 + $0xa0] sm:$0xff]  ;;  %v2080_v36 = vld [vmem:[%s4750_s6 + $0x218] sm:$0xff]  ;;  %2270 = vmatpush1.msra.mxu0 %v2081_v42  ;;  %v2075_v34 = vld [vmem:[%s4750_s6 + $0x1f0] sm:$0xff] }
 0x356   : > { %2845 = vmatpush3.msra.mxu1 %v2019_v41  ;;  %v2017_v56 = vld [vmem:[%s4750_s6 + $0x20] sm:$0xff]  ;;  %2271 = vmatprep.subr.mxu0 %v3109_v18  ;;  %v2016_v28 = vld [vmem:[%s4750_s6 + $0x18] sm:$0xff] }
 0x357   : > { %v1765_v14 = vadd.f32 %v1759_v6, %v1623_v58  ;;  %2846 = vmatprep.subr.mxu1 %v2034_v61  ;;  %2272 = vmatpush1.msra.mxu0 %v2080_v36  ;;  %v2078_v58 = vld [vmem:[%s4750_s6 + $0x208] sm:$0xff]  ;;  %v2101_v6 = vld [vmem:[%s4750_s6 + $0x2c0] sm:$0xff]  ;;  %v2059_v61 = vld [vmem:[%s4750_s6 + $0x170] sm:$0xff] }
 0x358   : > { %2847 = vmatpush3.msra.mxu1 %v2018_v57  ;;  %2273 = vmatprep.subr.mxu0 %v3109_v18  ;;  %v2074_v57 = vld [vmem:[%s4750_s6 + $0x1e8] sm:$0xff] }
 0x359   : > { %2848 = vmatprep.subr.mxu1 %v2033_v35  ;;  %v2058_v35 = vld [vmem:[%s4750_s6 + $0x168] sm:$0xff] }
 0x35a   : > { %2849 = vmatpush3.msra.mxu1 %v2017_v56 }
 0x378   : > { %v1893_v39 = vpop.f32.mrf.mxu0 }
 0x379   : > { %v1904_v62 = vadd.f32 %v1893_v39, %v1762_v59  ;;  %v2032_v59 = vld [vmem:[%s4750_s6 + $0x98] sm:$0xff]  ;;  %v2031_v39 = vld [vmem:[%s4750_s6 + $0x90] sm:$0xff] }
 0x37a   : > { %v1895_v2 = vpop.f32.mrf.mxu0  ;;  %2850 = vmatprep.subr.mxu1 %v2032_v59  ;;  %v2073_v59 = vld [vmem:[%s4750_s6 + $0x1e0] sm:$0xff] }
 0x37b   : > { %v4242_v3 = vadd.f32 %v1913_v60, %v1904_v62  ;;  %v1905_v4 = vadd.f32 %v1895_v2, %v1763_v63  ;;  %v2015_v62 = vld [vmem:[%s4750_s6 + $0x10] sm:$0xff]  ;;  %2851 = vmatpush3.msra.mxu1 %v2016_v28  ;;  %v2030_v63 = vld [vmem:[%s4750_s6 + $0x88] sm:$0xff]  ;;  %v2057_v28 = vld [vmem:[%s4750_s6 + $0x160] sm:$0xff] }
 0x37c   : > { %v1899_v8 = vpop.f32.mrf.mxu0  ;;  %2852 = vmatprep.subr.mxu1 %v2031_v39  ;;  %v2014_v2 = vld [vmem:[%s4750_s6 + $0x8] sm:$0xff] }
 0x37d   : > { %v4244_v11 = vadd.f32 %v1917_v1, %v1905_v4  ;;  %v1906_v12 = vadd.f32 %v1899_v8, %v1764_v5  ;;  %v1924_v15 = vmax.f32 %v4242_v3, 0.0  ;;  %2853 = vmatpush3.msra.mxu1 %v2015_v62  ;;  %v2029_v4 = vld [vmem:[%s4750_s6 + $0x80] sm:$0xff]  ;;  %v2102_v5 = vld [vmem:[%s4750_s6 + $0x2c8] sm:$0xff]  ;;  %v2100_v8 = vld [vmem:[%s4750_s6 + $0x2b8] sm:$0xff] }
 0x37e   : > { %v1901_v49 = vpop.f32.mrf.mxu0  ;;  %2854 = vmatprep.subr.mxu1 %v2030_v63  ;;  %v2097_v3 = vld [vmem:[%s4750_s6 + $0x2a0] sm:$0xff]  ;;  %v2056_v62 = vld [vmem:[%s4750_s6 + $0x158] sm:$0xff]  ;;  %v2071_v63 = vld [vmem:[%s4750_s6 + $0x1d0] sm:$0xff] }
 0x37f   : > { %v1925_v16 = vmax.f32 %v4244_v11, 0.0  ;;  %v4248_v20 = vadd.f32 %v1913_v60, %v1906_v12  ;;  %v1907_v40 = vadd.f32 %v1901_v49, %v1765_v14  ;;  %v2079_v60 = vld [vmem:[%s4750_s6 + $0x210] sm:$0xff]  ;;  %2855 = vmatpush3.msra.mxu1 %v2014_v2 }
 0x380   : > { %2274 = vmatpush1.msra.mxu0 %v2079_v60  ;;  %2856 = vmatprep.subr.mxu1 %v2029_v4  ;;  %v2055_v4 = vld [vmem:[%s4750_s6 + $0x150] sm:$0xff] }
 0x381   : > { %v1926_v54 = vmax.f32 %v4248_v20, 0.0  ;;  %v4251_v24 = vadd.f32 %v1917_v1, %v1907_v40  ;;  %v3037_v9 = vpack.i.bf16 %v1925_v16, %v1924_v15  ;;  %2275 = vmatprep.subr.mxu0 %v3109_v18  ;;  %v2077_v1 = vld [vmem:[%s4750_s6 + $0x200] sm:$0xff]  ;;  %v2096_v20 = vld [vmem:[%s4750_s6 + $0x298] sm:$0xff] }
 0x382   : > { %2276 = vmatpush1.msra.mxu0 %v2078_v58  ;;  %v2013_v40 = vld [vmem:[%s4750_s6] sm:$0xff]  ;;  %v2072_v58 = vld [vmem:[%s4750_s6 + $0x1d8] sm:$0xff] }
 0x383   : > { %3038 = vrot.lane.b32.xlu0 %v3037_v9, %s3111_s29  ;;  %1936 = vrot.lane.b32.xlu1 %v1926_v54, %s3111_s29  ;;  %v1927_v21 = vmax.f32 %v4251_v24, 0.0  ;;  %v2076_v9 = vld [vmem:[%s4750_s6 + $0x1f8] sm:$0xff] }
 0x384   : > { %2277 = vmatprep.subr.mxu0 %v3109_v18  ;;  %2857 = vmatpush3.msra.mxu1 %v2013_v40  ;;  %v2053_v40 = vld [vmem:[%s4750_s6 + $0x140] sm:$0xff] }
 0x385   : > { %2278 = vmatpush1.msra.mxu0 %v2077_v1  ;;  %2861 = vmatprep.subr.mxu1 %v2076_v9  ;;  %v2068_v9 = vld [vmem:[%s4750_s6 + $0x1b8] sm:$0xff] }
 0x386   : > { %2291 = vmatprep.subr.mxu0 %v3109_v18 }
 0x387   : > { %1938 = vrot.lane.b32.xlu0 %v1927_v21, %s3111_s29  ;;  %2292 = vmatpush2.msra.mxu0 %v2102_v5  ;;  %s3114_s29 = smov 48  }
 0x388   : > { %2293 = vmatprep.subr.mxu0 %v3109_v18 }
 0x389   : > { %2294 = vmatpush2.msra.mxu0 %v2101_v6  ;;  %v2070_v6 = vld [vmem:[%s4750_s6 + $0x1c8] sm:$0xff] }
 0x38a   : > { %2295 = vmatprep.subr.mxu0 %v3109_v18 }
 0x38b   : > { %2296 = vmatpush2.msra.mxu0 %v2100_v8 }
 0x38c   : > { %2297 = vmatprep.subr.mxu0 %v3109_v18 }
 0x38d   : > { %2298 = vmatpush2.msra.mxu0 %v2099_v23  ;;  %v2052_v23 = vld [vmem:[%s4750_s6 + $0x138] sm:$0xff] }
 0x38e   : > { %2299 = vmatprep.subr.mxu0 %v3109_v18 }
 0x38f   : > { %2300 = vmatpush2.msra.mxu0 %v2098_v31  ;;  %v2048_v31 = vld [vmem:[%s4750_s6 + $0x118] sm:$0xff] }
 0x390   : > { %2301 = vmatprep.subr.mxu0 %v3109_v18 }
 0x391   : > { %2302 = vmatpush2.msra.mxu0 %v2097_v3  ;;  %v2046_v3 = vld [vmem:[%s4750_s6 + $0x108] sm:$0xff] }
 0x392   : > { %2303 = vmatprep.subr.mxu0 %v3109_v18 }
 0x393   : > { %2304 = vmatpush2.msra.mxu0 %v2096_v20 }
 0x394   : > { %2305 = vmatprep.subr.mxu0 %v3109_v18 }
 0x395   : > { %2306 = vmatpush2.msra.mxu0 %v2095_v17  ;;  %v2329_v17 = vld [vmem:[%s4752_s8 + $0x58] sm:$0xff] }
 0x396   : > { %2307 = vmatprep.subr.mxu0 %v3109_v18 }
 0x397   : > { %2308 = vmatpush2.msra.mxu0 %v2094_v30  ;;  %v2325_v30 = vld [vmem:[%s4752_s8 + $0x38] sm:$0xff] }
 0x398   : > { %2309 = vmatprep.subr.mxu0 %v3109_v18 }
 0x399   : > { %2310 = vmatpush2.msra.mxu0 %v2093_v33  ;;  %v2323_v33 = vld [vmem:[%s4752_s8 + $0x28] sm:$0xff] }
 0x39a   : > { %2957 = vmatprep.subr.mxu0 %v3109_v18 }
 0x3f5   : > { %v3039_v12 = vpop.permute.xlu0 %3038  ;;  %v1937_v29 = vpop.permute.xlu1 %1936 }
 0x3f6   : > { %v3041_v14 = vunpack.i.h.bf16 %v3039_v12  ;;  %v3040_v49 = vunpack.i.l.bf16 %v3039_v12  ;;  %v2054_v12 = vld [vmem:[%s4750_s6 + $0x148] sm:$0xff] }
 0x3f8   : > { %v1948_v25 = vmax.f32 %v1925_v16, %v3041_v14  ;;  %v1941_v27 = vsel %vm1940_vm10, %v3040_v49, %v3041_v14  ;;  %v2069_v49 = vld [vmem:[%s4750_s6 + $0x1c0] sm:$0xff] }
 0x3f9   : > { %v1947_v19 = vmax.f32 %v1924_v15, %v1941_v27  ;;  %v1939_v43 = vpop.permute.xlu0 %1938  ;;  %v2051_v27 = vld [vmem:[%s4750_s6 + $0x130] sm:$0xff] }
 0x3fa   : > { %v1942_v44 = vsel %vm1940_vm10, %v1937_v29, %v1939_v43  ;;  %v1950_v22 = vmax.f32 %v1927_v21, %v1939_v43  ;;  %v1958_v16 = vrot.slane %v1948_v25, 1  ;;  %v2066_v29 = vld [vmem:[%s4750_s6 + $0x1a8] sm:$0xff]  ;;  %v2065_v43 = vld [vmem:[%s4750_s6 + $0x1a0] sm:$0xff] }
 0x3fb   : > { %v1949_v11 = vmax.f32 %v1926_v54, %v1942_v44  ;;  %v1955_v15 = vrot.slane %v1947_v19, 1  ;;  %v2049_v44 = vld [vmem:[%s4750_s6 + $0x120] sm:$0xff] }
 0x3fc   : > { %v1959_v45 = vrot.slane %v1950_v22, 1 }
 0x3fd   : > { %v1956_v46 = vrot.slane %v1949_v11, 1 }
 0x3fe   : > { %v1960_v24 = vsel %vm436_vm0, %v1958_v16, %v1959_v45  ;;  %v1968_v52 = vmax.f32 %v1950_v22, %v1959_v45  ;;  %v2064_v22 = vld [vmem:[%s4750_s6 + $0x198] sm:$0xff]  ;;  %v2047_v16 = vld [vmem:[%s4750_s6 + $0x110] sm:$0xff]  ;;  %v2062_v45 = vld [vmem:[%s4750_s6 + $0x188] sm:$0xff] }
 0x3ff   : > { %v1957_v54 = vsel %vm436_vm0, %v1955_v15, %v1956_v46  ;;  %v1966_v21 = vmax.f32 %v1948_v25, %v1960_v24  ;;  %v1967_v51 = vmax.f32 %v1949_v11, %v1956_v46  ;;  %v2067_v25 = vld [vmem:[%s4750_s6 + $0x1b0] sm:$0xff]  ;;  %v2061_v15 = vld [vmem:[%s4750_s6 + $0x180] sm:$0xff]  ;;  %vm2334_vm0 = vcmask 982016  }
 0x400   : > { %v1965_v13 = vmax.f32 %v1947_v19, %v1957_v54  ;;  %v2050_v19 = vld [vmem:[%s4750_s6 + $0x128] sm:$0xff]  ;;  %v2063_v11 = vld [vmem:[%s4750_s6 + $0x190] sm:$0xff]  ;;  %v2045_v24 = vld [vmem:[%s4750_s6 + $0x100] sm:$0xff] }
 0x401   : > { %v1982_v47 = vrot.slane %v1966_v21, 4  ;;  %v1972_v37 = vrot.slane %v1966_v21, 2  ;;  %v1991_v50 = vrot.slane %v1966_v21, 6  ;;  %v2332_v54 = vld [vmem:[%s4752_s8 + $0x70] sm:$0xff] }
 0x402   : > { %v1971_v32 = vrot.slane %v1965_v13, 2  ;;  %v1981_v38 = vrot.slane %v1965_v13, 4  ;;  %v1990_v48 = vrot.slane %v1965_v13, 6 }
 0x404   : > { %1973 = vrot.lane.b32.xlu1 %v1971_v32, %s3112_s19  ;;  %v3042_v26 = vpack.i.bf16 %v1982_v47, %v1981_v38  ;;  %v2328_v47 = vld [vmem:[%s4752_s8 + $0x50] sm:$0xff]  ;;  %v2327_v32 = vld [vmem:[%s4752_s8 + $0x48] sm:$0xff]  ;;  %v2326_v38 = vld [vmem:[%s4752_s8 + $0x40] sm:$0xff] }
 0x406   : > { %3043 = vrot.lane.b32.xlu0 %v3042_v26, %s3113_s28  ;;  %v2324_v26 = vld [vmem:[%s4752_s8 + $0x30] sm:$0xff]  ;;  %s404_s28 = sand.u32 1, %s3099_s22  }
 0x407   : > { %s405_s16 = scalar_lea.vmem [#allocation2], %s404_s28  ;;  %s2501_s20 = scalar_lea.sflag [#allocation3], %s404_s28 }
 0x408   : > { %1975 = vrot.lane.b32.xlu1 %v1972_v37, %s3112_s19  ;;  %v2322_v37 = vld [vmem:[%s4752_s8 + $0x20] sm:$0xff]  ;;  %s2513_s17 = sshll.u32 %s405_s16, 4  ;;  %s4709_s19 = scalar_lea.hbm %s4756_s12, %s2822_s30  ;;  %s2514_s17 = int_to_ptr.vmem [resolvable:$true] %s2513_s17 }
 0x409   : > { %s3047_s26 = scalar_lea.vmem %s2514_s17, 16 }
 0x40a   : > { %1992 = vrot.lane.b32.xlu0 %v1990_v48, %s3114_s29  ;;  %v2321_v48 = vld [vmem:[%s4752_s8 + $0x18] sm:$0xff]  ;;  %p3048_p11 = scmp.ne.s32.totalorder %s2514_s17, %s3047_s26 }
 0x40c   : > { %1994 = vrot.lane.b32.xlu1 %v1991_v50, %s3114_s29  ;;  %v2320_v50 = vld [vmem:[%s4752_s8 + $0x10] sm:$0xff]  ;;  %p3049_p12 = pnand %p3048_p11, %p3221_p5  ;;  %s3051_s29 = sshll.u32 %s3117_s25, 4  ;;  %s3052_s29 = int_to_ptr.vmem [resolvable:$false] %s3051_s29 }
 0x40d   : > { %p3054_p0 = scmp.lt.s32.totalorder %s2514_s17, %s3052_s29 }
 0x40e   : > { %2002 = vrot.lane.b32.xlu0 %v1967_v51, %s3115_s15  ;;  %v2319_v51 = vld [vmem:[%s4752_s8 + $0x8] sm:$0xff]  ;;  %p3050_p13 = pneg %p3049_p12 }
 0x410   : > { %2004 = vrot.lane.b32.xlu1 %v1968_v52, %s3115_s15  ;;  %v2318_v52 = vld [vmem:[%s4752_s8] sm:$0xff]  ;;  %s3053_s15 = scalar_lea.vmem %s3052_s29, 32 }
 0x411   : > { %p3055_p1 = scmp.lt.s32.totalorder %s3053_s15, %s3047_s26 }
 0x413   : > { %p3056_p2 = por %p3055_p1, %p3054_p0 }
 0x415   : > { %p3057_p3 = pnand %p3056_p2, %p3050_p13 }
 0x476   : > { %v4475_v53 = vpop.permute.xlu1 %1973 }
 0x477   : > { %v2009_v10 = vsel %vm1977_vm11, %v1966_v21, %v4475_v53  ;;  %v2331_v21 = vld [vmem:[%s4752_s8 + $0x68] sm:$0xff] }
 0x478   : > { %v4482_v55 = vpop.permute.xlu0 %3043  ;;  %2171 = vmatprep.mubr.f32.mxu1 %v2009_v10  ;;  %v2418_v10 = vld [vmem:[%s4754_s10 + $0x48] sm:$0xff] }
 0x479   : > { %v3046_v0 = vunpack.i.h.bf16 %v4482_v55  ;;  %v3045_v41 = vunpack.i.l.bf16 %v4482_v55  ;;  %2172 = vmatmul.mubr.f32.vlgmr.msra.gmra.mxu1 %v1965_v13  ;;  %v2330_v13 = vld [vmem:[%s4752_s8 + $0x60] sm:$0xff]  ;;  %v2416_v55 = vld [vmem:[%s4754_s10 + $0x38] sm:$0xff] }
 0x47a   : > { %2862 = vmatpush3.msra.mxu1 %v2060_v7  ;;  %v4492_v42 = vpop.permute.xlu1 %1975  ;;  %v2417_v7 = vld [vmem:[%s4754_s10 + $0x40] sm:$0xff] }
 0x47b   : > { %2863 = vmatprep.subr.mxu1 %v2075_v34  ;;  %v1987_v36 = vsel %vm444_vm1, %v3045_v41, %v3046_v0  ;;  %v1978_v46 = vsel %vm1977_vm11, %v4475_v53, %v4492_v42  ;;  %v2419_v53 = vld [vmem:[%s4754_s10 + $0x50] sm:$0xf]  ;;  %v2414_v0 = vld [vmem:[%s4754_s10 + $0x28] sm:$0xff] }
 0x47c   : > { %2864 = vmatpush3.msra.mxu1 %v2059_v61  ;;  %v1993_v56 = vpop.permute.xlu0 %1992  ;;  %v2010_v20 = vsel %vm444_vm1, %v1978_v46, %v3045_v41  ;;  %v2415_v34 = vld [vmem:[%s4754_s10 + $0x30] sm:$0xff]  ;;  %v2413_v41 = vld [vmem:[%s4754_s10 + $0x20] sm:$0xff]  ;;  %v2412_v61 = vld [vmem:[%s4754_s10 + $0x18] sm:$0xff]  ;;  %vm2421_vm1 = vcmask 687104  }
 0x47d   : > { %2865 = vmatprep.subr.mxu1 %v2074_v57  ;;  %v2011_v60 = vsel %vm1996_vm12, %v1987_v36, %v1993_v56 }
 0x47e   : > { %2866 = vmatpush3.msra.mxu1 %v2058_v35  ;;  %2241 = vmatprep.mubr.f32.mxu1 %v2011_v60  ;;  %v1995_v39 = vpop.permute.xlu1 %1994 }
 0x47f   : > { %2867 = vmatprep.subr.mxu1 %v2073_v59  ;;  %v1997_v1 = vsel %vm1996_vm12, %v1993_v56, %v1995_v39  ;;  %v2103_v59 = vld [vmem:[%s4751_s7] sm:$0x1] }
 0x480   : > { %2868 = vmatpush3.msra.mxu1 %v2057_v28  ;;  %v2003_v2 = vpop.permute.xlu0 %2002 }
 0x481   : > { %2869 = vmatprep.subr.mxu1 %v2072_v58  ;;  %v2012_v14 = vsel %vm2006_vm13, %v1997_v1, %v2003_v2 }
 0x482   : > { %2870 = vmatpush3.msra.mxu1 %v2056_v62  ;;  %v2005_v5 = vpop.permute.xlu1 %2004 }
 0x483   : > { %2871 = vmatprep.subr.mxu1 %v2071_v63  ;;  %v2007_v8 = vsel %vm2006_vm13, %v2003_v2, %v2005_v5  ;;  %v2411_v2 = vld [vmem:[%s4754_s10 + $0x10] sm:$0xff]  ;;  %v2409_v5 = vld [vmem:[%s4754_s10] sm:$0xff] }
 0x484   : > { %2872 = vmatpush3.msra.mxu1 %v2055_v4  ;;  %2818 = vmatprep.mubr.msk.f32.mxu0 %vm2104_vm14, %v2007_v8  ;;  %v2410_v4 = vld [vmem:[%s4754_s10 + $0x8] sm:$0xff] }
 0x485   : > { %2873 = vmatprep.subr.mxu1 %v2070_v6  ;;  %2312 = vmatmul.mubr.f32.vlgmr.msra.gmra.mxu0 %v2012_v14  ;;  %v2333_v6 = vld [vmem:[%s4753_s9] sm:$0x1] }
 0x486   : > { %2874 = vmatpush3.msra.mxu1 %v2054_v12  ;;  %2979 = vmatprep.mubr.msk.f32.mxu0 %vm3116_vm15, %v3109_v18 }
 0x487   : > { %2875 = vmatprep.subr.mxu1 %v2069_v49  ;;  %2958 = vmatpush3.msk.msra.mxu0 %vm892_vm4, %v2419_v53 }
 0x488   : > { %2876 = vmatpush3.msra.mxu1 %v2053_v40  ;;  %2959 = vmatprep.subr.mxu0 %v3109_v18 }
 0x489   : > { %2877 = vmatprep.subr.mxu1 %v2068_v9  ;;  %2960 = vmatpush3.msra.mxu0 %v2418_v10 }
 0x48a   : > { %2878 = vmatpush3.msra.mxu1 %v2052_v23  ;;  %2961 = vmatprep.subr.mxu0 %v3109_v18 }
 0x48b   : > { %2879 = vmatprep.subr.mxu1 %v2067_v25  ;;  %2962 = vmatpush3.msra.mxu0 %v2417_v7 }
 0x48c   : > { %2880 = vmatpush3.msra.mxu1 %v2051_v27  ;;  %2963 = vmatprep.subr.mxu0 %v3109_v18 }
 0x48d   : > { %2881 = vmatprep.subr.mxu1 %v2066_v29  ;;  %2964 = vmatpush3.msra.mxu0 %v2416_v55 }
 0x48e   : > { %2882 = vmatpush3.msra.mxu1 %v2050_v19  ;;  %2965 = vmatprep.subr.mxu0 %v3109_v18 }
 0x48f   : > { %2883 = vmatprep.subr.mxu1 %v2065_v43  ;;  %2966 = vmatpush3.msra.mxu0 %v2415_v34 }
 0x490   : > { %2884 = vmatpush3.msra.mxu1 %v2049_v44  ;;  %2967 = vmatprep.subr.mxu0 %v3109_v18 }
 0x491   : > { %2885 = vmatprep.subr.mxu1 %v2064_v22  ;;  %2968 = vmatpush3.msra.mxu0 %v2414_v0 }
 0x492   : > { %2886 = vmatpush3.msra.mxu1 %v2048_v31  ;;  %2969 = vmatprep.subr.mxu0 %v3109_v18 }
 0x493   : > { %2887 = vmatprep.subr.mxu1 %v2063_v11  ;;  %2970 = vmatpush3.msra.mxu0 %v2413_v41 }
 0x494   : > { %2888 = vmatpush3.msra.mxu1 %v2047_v16  ;;  %2971 = vmatprep.subr.mxu0 %v3109_v18 }
 0x495   : > { %2889 = vmatprep.subr.mxu1 %v2062_v45  ;;  %2972 = vmatpush3.msra.mxu0 %v2412_v61 }
 0x496   : > { %2890 = vmatpush3.msra.mxu1 %v2046_v3  ;;  %2973 = vmatprep.subr.mxu0 %v3109_v18 }
 0x497   : > { %2891 = vmatprep.subr.mxu1 %v2061_v15  ;;  %2974 = vmatpush3.msra.mxu0 %v2411_v2 }
 0x498   : > { %2892 = vmatpush3.msra.mxu1 %v2045_v24  ;;  %2975 = vmatprep.subr.mxu0 %v3109_v18 }
 0x499   : > { %2242 = vmatmul.mubr.f32.vlgmr.msra.gmra.mxu1 %v2010_v20  ;;  %2924 = vmatprep.subr.mxu1 %v3109_v18 }
 0x49a   : > { %2925 = vmatpush3.msra.mxu1 %v2332_v54  ;;  %2954 = vmatprep.mubr.msk.f32.mxu1 %vm3116_vm15, %v3109_v18 }
 0x49b   : > { %2926 = vmatprep.subr.mxu1 %v3109_v18  ;;  %2976 = vmatpush3.msra.mxu0 %v2410_v4 }
 0x49c   : > { %2927 = vmatpush3.msra.mxu1 %v2331_v21  ;;  %2977 = vmatprep.subr.mxu0 %v3109_v18 }
 0x49d   : > { %2928 = vmatprep.subr.mxu1 %v3109_v18  ;;  %2978 = vmatpush3.msra.mxu0 %v2409_v5 }
 0x49e   : > { %2929 = vmatpush3.msra.mxu1 %v2330_v13 }
 0x49f   : > { %2930 = vmatprep.subr.mxu1 %v3109_v18 }
 0x4a0   : > { %2931 = vmatpush3.msra.mxu1 %v2329_v17 }
 0x4a1   : > { %2932 = vmatprep.subr.mxu1 %v3109_v18 }
 0x4a2   : > { %2933 = vmatpush3.msra.mxu1 %v2328_v47 }
 0x4a3   : > { %2934 = vmatprep.subr.mxu1 %v3109_v18 }
 0x4a4   : > { %2935 = vmatpush3.msra.mxu1 %v2327_v32 }
 0x4a5   : > { %2936 = vmatprep.subr.mxu1 %v3109_v18 }
 0x4a6   : > { %2937 = vmatpush3.msra.mxu1 %v2326_v38 }
 0x4a7   : > { %2938 = vmatprep.subr.mxu1 %v3109_v18 }
 0x4a8   : > { %2939 = vmatpush3.msra.mxu1 %v2325_v30 }
 0x4a9   : > { %2940 = vmatprep.subr.mxu1 %v3109_v18 }
 0x4aa   : > { %2941 = vmatpush3.msra.mxu1 %v2324_v26 }
 0x4ab   : > { %2942 = vmatprep.subr.mxu1 %v3109_v18 }
 0x4ac   : > { %2943 = vmatpush3.msra.mxu1 %v2323_v33 }
 0x4ad   : > { %2944 = vmatprep.subr.mxu1 %v3109_v18 }
 0x4ae   : > { %2945 = vmatpush3.msra.mxu1 %v2322_v37 }
 0x4af   : > { %2946 = vmatprep.subr.mxu1 %v3109_v18 }
 0x4b0   : > { %2947 = vmatpush3.msra.mxu1 %v2321_v48 }
 0x4b1   : > { %2948 = vmatprep.subr.mxu1 %v3109_v18 }
 0x4b2   : > { %2949 = vmatpush3.msra.mxu1 %v2320_v50 }
 0x4b3   : > { %2950 = vmatprep.subr.mxu1 %v3109_v18 }
 0x4b4   : > { %2951 = vmatpush3.msra.mxu1 %v2319_v51 }
 0x4b5   : > { %2952 = vmatprep.subr.mxu1 %v3109_v18  ;;  %v2420_v18 = vld [vmem:[%s4755_s11] sm:$0x1] }
 0x4b6   : > { %2953 = vmatpush3.msra.mxu1 %v2318_v52 }
 0x539   : > { %v2858_v35 = vpop.f32.mrf.mxu1 }
 0x53b   : > { %v2859_v36 = vpop.f32.mrf.mxu1 }
 0x53c   : > { %v2860_v56 = vadd.f32 %v2859_v36, %v2858_v35 }
 0x53e   : > { %v2174_v39 = vadd.f32 %v2860_v56, %v2103_v59 }
 0x545   : > { %v2313_v42 = vpop.f32.mrf.mxu0 }
 0x547   : > { %v2315_v57 = vpop.f32.mrf.mxu0 }
 0x559   : > { %v2893_v60 = vpop.f32.mrf.mxu1 }
 0x55b   : > { %v2894_v28 = vpop.f32.mrf.mxu1 }
 0x55c   : > { %v2895_v58 = vadd.f32 %v2894_v28, %v2893_v60 }
 0x55e   : > { %v2244_v62 = vadd.f32 %v2895_v58, %v2174_v39 }
 0x560   : > { %v2314_v63 = vadd.f32 %v2313_v42, %v2244_v62 }
 0x562   : > { %v2317_v1 = vmax.f32 %v2314_v63, 0.0 }
 0x564   : > { %2955 = vmatmul.mubr.msk.f32.vlgmr.msra.gmra.mxu1 %vm2334_vm0, %v2317_v1 }
 0x624   : > { %v2404_v8 = vpop.f32.mrf.mxu1 }
 0x625   : > { %v2405_v12 = vadd.f32 %v2404_v8, %v2333_v6 }
 0x626   : > { %v2956_v14 = vpop.f32.mrf.mxu1 }
 0x627   : > { %v2408_v49 = vmax.f32 %v2405_v12, 0.0 }
 0x629   : > { %2980 = vmatmul.mubr.msk.f32.vlgmr.msra.gmra.mxu0 %vm2421_vm1, %v2408_v49 }
 0x6e9   : > { %v2494_v40 = vpop.f32.mrf.mxu0 }
 0x6ea   : > { %v2495_v9 = vadd.f32 %v2494_v40, %v2420_v18 }
 0x6eb   : > { %v2981_v23 = vpop.f32.mrf.mxu0 }
 0x6ec   : > { %2499 = vst.msk [vmem:[%s405_s16] sm:$0x1] %vm2498_vm2, %v2495_v9 }
 0x6ed   : > { %3060 = shalt.err (!%p3057_p3)
}
 0x6ee   : > { %s3061_s30 = scalar_lea.hbm %s4709_s19, 16  ;;  %s3065_s18 = scalar_lea.hbm %s4756_s12, 32 }
 0x6ef   : > { %p3062_p4 = scmp.ne.s32.totalorder %s4709_s19, %s3061_s30  ;;  %p3066_p9 = scmp.lt.s32.totalorder %s4709_s19, %s4756_s12 }
 0x6f0   : > { %p3067_p10 = scmp.lt.s32.totalorder %s3065_s18, %s3061_s30 }
 0x6f1   : > { %p3063_p7 = pnand %p3062_p4, %p3221_p5 }
 0x6f2   : > { %p3068_p11 = por %p3067_p10, %p3066_p9 }
 0x6f3   : > { %p3064_p8 = pneg %p3063_p7 }
 0x6f5   : > { %p3069_p12 = pnand %p3068_p11, %p3064_p8 }
 0x6f7   : > { %3072 = shalt.err (!%p3069_p12)
}
 0x6f8   : > { %2990 = dma.vmem_to_hbm [thread:$0]  (%p3221_p5), %s2514_s17, 16, %s4709_s19, %s2501_s20  }
 0x6f9 PF: > { %p2996_p13 = scmp.ge.s32.totalorder %s3107_s24, 2  ;;  %s2525_s26 = sand.u32 1, %s3095_s21  }
 0x6fa   : > { %s2526_s29 = scalar_lea.sflag [#allocation3], %s2525_s26 }
 0x6fb   : > { %p2993_p0 = pnand %p2996_p13, %p3225_p6 }
 0x6fd   : > { %p2994_p1 = pneg %p2993_p0 }
 0x6ff   : > { %3090 = dma.done.wait (%p2994_p1), %s2526_s29, 16  }
 0x700   : > { %3092 = vsyncadd (%p2994_p1), %s2526_s29, 4294967280  ;;  %s4762_s15 = sld [smem:[#allocation5_spill]]  ;;  %p22_p2 = scmp.ge.s32.totalorder %s3208_s27, 4  }
 0x701   : > { %s4763_s23 = sld [smem:[#allocation6_spill]]  ;;  %s4764_s21 = smov %s3099_s22 }
 0x702   : > { %s4766_s24 = smov %s3208_s27  ;;  %24 = sbr.rel (!%p22_p2) target bundleno = 3 (0x3), region = 111 }
 0x706   : > { %s4765_s22 = smov %s4762_s15 }
 0x707   :  { %2530 = vsyncpa [#allocation3], 1 }
 0x708   :  { %2532 = vsyncpa [#allocation3 + $0x1], 1 }

</bundles_post_ra>
